<compile_context>
chip_gen: v7x
topology: tpu7x:2x2x1
jax: 0.10.0
libtpu: 0.0.40
codegen_flags: <defaults>
</compile_context>

<pallas_src>
import functools

import numpy as np
import jax
import jax.numpy as jnp
from jax.experimental import pallas as pl
from jax.experimental.pallas import tpu as pltpu


def _mm(a, b):
    # Full-f32 MXU matmul with f32 accumulation (explicit precision per review).
    return jnp.dot(a, b,
                   preferred_element_type=jnp.float32,
                   precision=jax.lax.Precision.HIGHEST)


def _cmatmul(ar, ai, br, bi):
    """Karatsuba complex matmul: 3 real MXU matmuls instead of 4."""
    t1 = _mm(ar, br)
    t2 = _mm(ai, bi)
    t3 = _mm(ar + ai, br + bi)
    return t1 - t2, t3 - t1 - t2


def _pforward_kernel(C, H, square, o_re_ref, o_im_ref, c_re_ref, c_im_ref,
                     m_ref, *refs):
    # Per-batch block. Shapes:
    #   o_*   : (H, W)      frame-0 image
    #   c_*   : (C*H, W)    coil maps, coil-stacked along rows
    #   m     : (H, W)      sampling mask
    #   A_H   : (H, H)      shift-folded row DFT operator
    #   A_W^T : (W, W)      shift-folded column DFT operator (transposed);
    #                       omitted (== A_H) when H == W (symmetric operator)
    #   out_* : (C*H, W)
    if square:
        ah_re_ref, ah_im_ref, out_re_ref, out_im_ref = refs
        awt_re_ref, awt_im_ref = ah_re_ref, ah_im_ref
    else:
        (ah_re_ref, ah_im_ref, awt_re_ref, awt_im_ref,
         out_re_ref, out_im_ref) = refs

    o_re = o_re_ref[...]
    o_im = o_im_ref[...]
    m = m_ref[...]
    c_re = c_re_ref[...]
    c_im = c_im_ref[...]
    ah_re = ah_re_ref[...]
    ah_im = ah_im_ref[...]
    awt_re = awt_re_ref[...]
    awt_im = awt_im_ref[...]

    # Coil weighting CI = c * o (complex, elementwise on the VPU). Replicate the
    # image down the coil-stacked row axis so everything stays a 2-D slab.
    ob_re = jnp.broadcast_to(o_re[None, :, :], (C, H, o_re.shape[-1]))
    ob_re = ob_re.reshape(C * H, o_re.shape[-1])
    ob_im = jnp.broadcast_to(o_im[None, :, :], (C, H, o_im.shape[-1]))
    ob_im = ob_im.reshape(C * H, o_im.shape[-1])
    ci_re = c_re * ob_re - c_im * ob_im
    ci_im = c_re * ob_im + c_im * ob_re

    # Column DFT, stacked over all coils: U = CI @ A_W^T -> one big matmul with
    # M = C*H (fills the MXU instead of C tiny per-coil matmuls).
    u_re, u_im = _cmatmul(ci_re, ci_im, awt_re, awt_im)

    # Row DFT per coil: K_c = A_H @ U_c, then k-space masking + store.
    ah_sum = ah_re + ah_im            # hoisted Karatsuba term (shared by all coils)
    for c in range(C):                # static unroll: full scheduler visibility
        lo = c * H
        ur = u_re[lo:lo + H, :]
        ui = u_im[lo:lo + H, :]
        s1 = _mm(ah_re, ur)
        s2 = _mm(ah_im, ui)
        s3 = _mm(ah_sum, ur + ui)
        k_re = s1 - s2
        k_im = s3 - s1 - s2
        out_re_ref[lo:lo + H, :] = k_re * m
        out_im_ref[lo:lo + H, :] = k_im * m


def _shift_fft_shift_matrix(n):
    """Dense matrix M such that M @ x == fftshift(fft(fftshift(x))) along that axis."""
    eye = np.eye(n)
    mat = np.fft.fftshift(np.fft.fft(np.fft.fftshift(eye, axes=0), axis=0), axes=0)
    return mat.astype(np.complex64)


def pforward(o_re, o_im, c_re, c_im, m):
    """o_*: [B, H, W, T] float32 (re/im of the image frames)
       c_*: [B, C, H, W] float32 (re/im of coil maps)
       m  : [B, H, W]    float32 (sampling mask)
       returns (out_re, out_im): [B, C, H, W] float32 each."""
    B, C, H, W = c_re.shape

    # o1[..., 0] — frame selection kept as cheap XLA glue (image tensor is C x
    # smaller than the coil maps; keeps the kernel's image block a dense DMA).
    o0_re = o_re[..., 0]
    o0_im = o_im[..., 0]

    # Coil-stacked views: free reshapes (contiguous layout), kernel stays 2-D.
    c2_re = c_re.reshape(B, C * H, W)
    c2_im = c_im.reshape(B, C * H, W)

    # Shift-folded DFT operators. For H == W the operator is symmetric (even-n
    # fftshift is an involution), so A_W^T == A_H and one pair suffices.
    ah = _shift_fft_shift_matrix(H)
    awt = _shift_fft_shift_matrix(W).T
    square = (H == W) and bool(np.allclose(awt, ah))

    ah_re = jnp.asarray(ah.real, jnp.float32)
    ah_im = jnp.asarray(ah.imag, jnp.float32)

    spec_hw = pl.BlockSpec((None, H, W), lambda b: (b, 0, 0))
    spec_stack = pl.BlockSpec((None, C * H, W), lambda b: (b, 0, 0))
    spec_hh = pl.BlockSpec((H, H), lambda b: (0, 0))
    spec_ww = pl.BlockSpec((W, W), lambda b: (0, 0))

    in_specs = [spec_hw, spec_hw, spec_stack, spec_stack, spec_hw,
                spec_hh, spec_hh]
    args = [o0_re, o0_im, c2_re, c2_im, m, ah_re, ah_im]
    if not square:
        awt_re = jnp.asarray(awt.real, jnp.float32)
        awt_im = jnp.asarray(awt.imag, jnp.float32)
        in_specs += [spec_ww, spec_ww]
        args += [awt_re, awt_im]

    # VMEM budget: double-buffered pipelined blocks + DFT operators + temps.
    # Clamped to be safe on v5e/v6e (128 MiB physical) and v7x (64 MiB physical).
    plane = 4 * H * W
    est = (2 * (3 * plane + 4 * C * plane)       # double-buffered I/O blocks
           + 2 * 4 * (H * H + W * W)             # DFT operators (re/im, 2 bufs)
           + 10 * C * plane)                     # CI / U / matmul temporaries
    vmem_limit = int(min(max(4 * est, 32 * 1024 * 1024), 48 * 1024 * 1024))

    out_re2, out_im2 = pl.pallas_call(
        functools.partial(_pforward_kernel, C, H, square),
        out_shape=(jax.ShapeDtypeStruct((B, C * H, W), jnp.float32),
                   jax.ShapeDtypeStruct((B, C * H, W), jnp.float32)),
        grid=(B,),
        in_specs=in_specs,
        out_specs=(spec_stack, spec_stack),
        compiler_params=pltpu.CompilerParams(
            dimension_semantics=("parallel",),
            vmem_limit_bytes=vmem_limit),
    )(*args)
    # Free metadata reshape back to the PyTorch layout.
    return out_re2.reshape(B, C, H, W), out_im2.reshape(B, C, H, W)


if __name__ == "__main__":
    B, C, H, W, T = 2, 4, 16, 16, 3

    key = jax.random.PRNGKey(0)
    k1, k2, k3, k4, k5 = jax.random.split(key, 5)
    o_re = jax.random.normal(k1, (B, H, W, T), jnp.float32)
    o_im = jax.random.normal(k2, (B, H, W, T), jnp.float32)
    c_re = jax.random.normal(k3, (B, C, H, W), jnp.float32)
    c_im = jax.random.normal(k4, (B, C, H, W), jnp.float32)
    m = (jax.random.uniform(k5, (B, H, W)) > 0.5).astype(jnp.float32)

    out_re, out_im = pforward(o_re, o_im, c_re, c_im, m)
    jax.block_until_ready((out_re, out_im))

    # Pure-JAX reference (same math as the PyTorch module).
    o0 = (o_re + 1j * o_im)[..., 0]
    coil = c_re + 1j * c_im
    ci = coil * o0[:, None]
    ksp = jnp.fft.fftshift(jnp.fft.fft2(jnp.fft.fftshift(ci, axes=(-2, -1))),
                           axes=(-2, -1))
    ref = ksp * m[:, None]

    assert jnp.allclose(out_re, ref.real, atol=1e-2, rtol=1e-3), "real part mismatch"
    assert jnp.allclose(out_im, ref.imag, atol=1e-2, rtol=1e-3), "imag part mismatch"
    print("KERNEL_OK")
</pallas_src>

<mosaic_0001>
module attributes {stable_mosaic.version = 11 : i64} {
  func.func @_pforward_kernel(%arg0: i32, %arg1: memref<1x16x16xf32, #tpu.memory_space<vmem>>, %arg2: memref<1x16x16xf32, #tpu.memory_space<vmem>>, %arg3: memref<1x64x16xf32, #tpu.memory_space<vmem>>, %arg4: memref<1x64x16xf32, #tpu.memory_space<vmem>>, %arg5: memref<1x16x16xf32, #tpu.memory_space<vmem>>, %arg6: memref<16x16xf32, #tpu.memory_space<vmem>>, %arg7: memref<16x16xf32, #tpu.memory_space<vmem>>, %arg8: memref<1x64x16xf32, #tpu.memory_space<vmem>>, %arg9: memref<1x64x16xf32, #tpu.memory_space<vmem>>) attributes {dimension_semantics = [#tpu.dimension_semantics<parallel>], iteration_bounds = array<i64: 2>, scalar_prefetch = 0 : i64, scratch_operands = 0 : i64, tpu.core_type = #tpu.core_type<tc>, window_params = [{transform_indices = @transform_0, window_bounds = array<i64: 1, 16, 16>}, {transform_indices = @transform_1, window_bounds = array<i64: 1, 16, 16>}, {transform_indices = @transform_2, window_bounds = array<i64: 1, 64, 16>}, {transform_indices = @transform_3, window_bounds = array<i64: 1, 64, 16>}, {transform_indices = @transform_4, window_bounds = array<i64: 1, 16, 16>}, {pipeline_mode = #tpu.pipeline_mode<synchronous>, transform_indices = @transform_5, window_bounds = array<i64: 16, 16>}, {pipeline_mode = #tpu.pipeline_mode<synchronous>, transform_indices = @transform_6, window_bounds = array<i64: 16, 16>}, {transform_indices = @transform_7, window_bounds = array<i64: 1, 64, 16>}, {transform_indices = @transform_8, window_bounds = array<i64: 1, 64, 16>}]} {
    %c0 = arith.constant 0 : index
    %c0_0 = arith.constant 0 : index
    %c0_1 = arith.constant 0 : index
    %0 = vector.load %arg1[%c0, %c0_0, %c0_1] : memref<1x16x16xf32, #tpu.memory_space<vmem>>, vector<1x16x16xf32>
    %1 = vector.shape_cast %0 : vector<1x16x16xf32> to vector<16x16xf32>
    %c0_2 = arith.constant 0 : index
    %c0_3 = arith.constant 0 : index
    %c0_4 = arith.constant 0 : index
    %2 = vector.load %arg2[%c0_2, %c0_3, %c0_4] : memref<1x16x16xf32, #tpu.memory_space<vmem>>, vector<1x16x16xf32>
    %3 = vector.shape_cast %2 : vector<1x16x16xf32> to vector<16x16xf32>
    %c0_5 = arith.constant 0 : index
    %c0_6 = arith.constant 0 : index
    %c0_7 = arith.constant 0 : index
    %4 = vector.load %arg5[%c0_5, %c0_6, %c0_7] : memref<1x16x16xf32, #tpu.memory_space<vmem>>, vector<1x16x16xf32>
    %5 = vector.shape_cast %4 : vector<1x16x16xf32> to vector<16x16xf32>
    %c0_8 = arith.constant 0 : index
    %c0_9 = arith.constant 0 : index
    %c0_10 = arith.constant 0 : index
    %6 = vector.load %arg3[%c0_8, %c0_9, %c0_10] : memref<1x64x16xf32, #tpu.memory_space<vmem>>, vector<1x64x16xf32>
    %7 = vector.shape_cast %6 : vector<1x64x16xf32> to vector<64x16xf32>
    %c0_11 = arith.constant 0 : index
    %c0_12 = arith.constant 0 : index
    %c0_13 = arith.constant 0 : index
    %8 = vector.load %arg4[%c0_11, %c0_12, %c0_13] : memref<1x64x16xf32, #tpu.memory_space<vmem>>, vector<1x64x16xf32>
    %9 = vector.shape_cast %8 : vector<1x64x16xf32> to vector<64x16xf32>
    %c0_14 = arith.constant 0 : index
    %c0_15 = arith.constant 0 : index
    %10 = vector.load %arg6[%c0_14, %c0_15] : memref<16x16xf32, #tpu.memory_space<vmem>>, vector<16x16xf32>
    %c0_16 = arith.constant 0 : index
    %c0_17 = arith.constant 0 : index
    %11 = vector.load %arg7[%c0_16, %c0_17] : memref<16x16xf32, #tpu.memory_space<vmem>>, vector<16x16xf32>
    %c0_18 = arith.constant 0 : index
    %c0_19 = arith.constant 0 : index
    %12 = vector.load %arg6[%c0_18, %c0_19] : memref<16x16xf32, #tpu.memory_space<vmem>>, vector<16x16xf32>
    %c0_20 = arith.constant 0 : index
    %c0_21 = arith.constant 0 : index
    %13 = vector.load %arg7[%c0_20, %c0_21] : memref<16x16xf32, #tpu.memory_space<vmem>>, vector<16x16xf32>
    %14 = vector.shape_cast %1 : vector<16x16xf32> to vector<1x16x16xf32>
    %15 = vector.shape_cast %14 : vector<1x16x16xf32> to vector<1x16x16xf32>
    %16 = vector.broadcast %15 : vector<1x16x16xf32> to vector<4x16x16xf32>
    %17 = vector.shape_cast %16 : vector<4x16x16xf32> to vector<64x16xf32>
    %18 = vector.shape_cast %3 : vector<16x16xf32> to vector<1x16x16xf32>
    %19 = vector.shape_cast %18 : vector<1x16x16xf32> to vector<1x16x16xf32>
    %20 = vector.broadcast %19 : vector<1x16x16xf32> to vector<4x16x16xf32>
    %21 = vector.shape_cast %20 : vector<4x16x16xf32> to vector<64x16xf32>
    %22 = arith.mulf %7, %17 : vector<64x16xf32>
    %23 = arith.mulf %9, %21 : vector<64x16xf32>
    %24 = arith.subf %22, %23 : vector<64x16xf32>
    %25 = arith.mulf %7, %21 : vector<64x16xf32>
    %26 = arith.mulf %9, %17 : vector<64x16xf32>
    %27 = arith.addf %25, %26 : vector<64x16xf32>
    %cst = arith.constant dense<0.000000e+00> : vector<64x16xf32>
    %28 = tpu.matmul %24, %12, %cst {dimension_numbers = #tpu.dot_dimension_numbers<[1], [0], [0], [1], [0, 0, 1, 1], [], []>, precision = #tpu.contract_precision<fp32>} : vector<64x16xf32>, vector<16x16xf32>, vector<64x16xf32> -> vector<64x16xf32>
    %cst_22 = arith.constant dense<0.000000e+00> : vector<64x16xf32>
    %29 = tpu.matmul %27, %13, %cst_22 {dimension_numbers = #tpu.dot_dimension_numbers<[1], [0], [0], [1], [0, 0, 1, 1], [], []>, precision = #tpu.contract_precision<fp32>} : vector<64x16xf32>, vector<16x16xf32>, vector<64x16xf32> -> vector<64x16xf32>
    %30 = arith.addf %24, %27 : vector<64x16xf32>
    %31 = arith.addf %12, %13 : vector<16x16xf32>
    %cst_23 = arith.constant dense<0.000000e+00> : vector<64x16xf32>
    %32 = tpu.matmul %30, %31, %cst_23 {dimension_numbers = #tpu.dot_dimension_numbers<[1], [0], [0], [1], [0, 0, 1, 1], [], []>, precision = #tpu.contract_precision<fp32>} : vector<64x16xf32>, vector<16x16xf32>, vector<64x16xf32> -> vector<64x16xf32>
    %33 = arith.subf %28, %29 : vector<64x16xf32>
    %34 = arith.subf %32, %28 : vector<64x16xf32>
    %35 = arith.subf %34, %29 : vector<64x16xf32>
    %36 = arith.addf %10, %11 : vector<16x16xf32>
    %37 = vector.extract_strided_slice %33 {offsets = [0, 0], sizes = [16, 16], strides = [1, 1]} : vector<64x16xf32> to vector<16x16xf32>
    %38 = vector.extract_strided_slice %35 {offsets = [0, 0], sizes = [16, 16], strides = [1, 1]} : vector<64x16xf32> to vector<16x16xf32>
    %cst_24 = arith.constant dense<0.000000e+00> : vector<16x16xf32>
    %39 = tpu.matmul %10, %37, %cst_24 {dimension_numbers = #tpu.dot_dimension_numbers<[1], [0], [0], [1], [0, 0, 1, 1], [], []>, precision = #tpu.contract_precision<fp32>} : vector<16x16xf32>, vector<16x16xf32>, vector<16x16xf32> -> vector<16x16xf32>
    %cst_25 = arith.constant dense<0.000000e+00> : vector<16x16xf32>
    %40 = tpu.matmul %11, %38, %cst_25 {dimension_numbers = #tpu.dot_dimension_numbers<[1], [0], [0], [1], [0, 0, 1, 1], [], []>, precision = #tpu.contract_precision<fp32>} : vector<16x16xf32>, vector<16x16xf32>, vector<16x16xf32> -> vector<16x16xf32>
    %41 = arith.addf %37, %38 : vector<16x16xf32>
    %cst_26 = arith.constant dense<0.000000e+00> : vector<16x16xf32>
    %42 = tpu.matmul %36, %41, %cst_26 {dimension_numbers = #tpu.dot_dimension_numbers<[1], [0], [0], [1], [0, 0, 1, 1], [], []>, precision = #tpu.contract_precision<fp32>} : vector<16x16xf32>, vector<16x16xf32>, vector<16x16xf32> -> vector<16x16xf32>
    %43 = arith.subf %39, %40 : vector<16x16xf32>
    %44 = arith.subf %42, %39 : vector<16x16xf32>
    %45 = arith.subf %44, %40 : vector<16x16xf32>
    %46 = arith.mulf %43, %5 : vector<16x16xf32>
    %c0_27 = arith.constant 0 : index
    %c0_28 = arith.constant 0 : index
    %c0_29 = arith.constant 0 : index
    %47 = vector.load %arg8[%c0_27, %c0_28, %c0_29] : memref<1x64x16xf32, #tpu.memory_space<vmem>>, vector<1x16x16xf32>
    %48 = vector.shape_cast %47 : vector<1x16x16xf32> to vector<16x16xf32>
    %49 = vector.shape_cast %46 : vector<16x16xf32> to vector<1x16x16xf32>
    tpu.vector_store %arg8[%c0_27, %c0_28, %c0_29], %49 {strides = array<i32>} : memref<1x64x16xf32, #tpu.memory_space<vmem>>, vector<1x16x16xf32>,
    %50 = arith.mulf %45, %5 : vector<16x16xf32>
    %c0_30 = arith.constant 0 : index
    %c0_31 = arith.constant 0 : index
    %c0_32 = arith.constant 0 : index
    %51 = vector.load %arg9[%c0_30, %c0_31, %c0_32] : memref<1x64x16xf32, #tpu.memory_space<vmem>>, vector<1x16x16xf32>
    %52 = vector.shape_cast %51 : vector<1x16x16xf32> to vector<16x16xf32>
    %53 = vector.shape_cast %50 : vector<16x16xf32> to vector<1x16x16xf32>
    tpu.vector_store %arg9[%c0_30, %c0_31, %c0_32], %53 {strides = array<i32>} : memref<1x64x16xf32, #tpu.memory_space<vmem>>, vector<1x16x16xf32>,
    %54 = vector.extract_strided_slice %33 {offsets = [16, 0], sizes = [16, 16], strides = [1, 1]} : vector<64x16xf32> to vector<16x16xf32>
    %55 = vector.extract_strided_slice %35 {offsets = [16, 0], sizes = [16, 16], strides = [1, 1]} : vector<64x16xf32> to vector<16x16xf32>
    %cst_33 = arith.constant dense<0.000000e+00> : vector<16x16xf32>
    %56 = tpu.matmul %10, %54, %cst_33 {dimension_numbers = #tpu.dot_dimension_numbers<[1], [0], [0], [1], [0, 0, 1, 1], [], []>, precision = #tpu.contract_precision<fp32>} : vector<16x16xf32>, vector<16x16xf32>, vector<16x16xf32> -> vector<16x16xf32>
    %cst_34 = arith.constant dense<0.000000e+00> : vector<16x16xf32>
    %57 = tpu.matmul %11, %55, %cst_34 {dimension_numbers = #tpu.dot_dimension_numbers<[1], [0], [0], [1], [0, 0, 1, 1], [], []>, precision = #tpu.contract_precision<fp32>} : vector<16x16xf32>, vector<16x16xf32>, vector<16x16xf32> -> vector<16x16xf32>
    %58 = arith.addf %54, %55 : vector<16x16xf32>
    %cst_35 = arith.constant dense<0.000000e+00> : vector<16x16xf32>
    %59 = tpu.matmul %36, %58, %cst_35 {dimension_numbers = #tpu.dot_dimension_numbers<[1], [0], [0], [1], [0, 0, 1, 1], [], []>, precision = #tpu.contract_precision<fp32>} : vector<16x16xf32>, vector<16x16xf32>, vector<16x16xf32> -> vector<16x16xf32>
    %60 = arith.subf %56, %57 : vector<16x16xf32>
    %61 = arith.subf %59, %56 : vector<16x16xf32>
    %62 = arith.subf %61, %57 : vector<16x16xf32>
    %63 = arith.mulf %60, %5 : vector<16x16xf32>
    %c0_36 = arith.constant 0 : index
    %c16 = arith.constant 16 : index
    %c0_37 = arith.constant 0 : index
    %64 = vector.load %arg8[%c0_36, %c16, %c0_37] : memref<1x64x16xf32, #tpu.memory_space<vmem>>, vector<1x16x16xf32>
    %65 = vector.shape_cast %64 : vector<1x16x16xf32> to vector<16x16xf32>
    %66 = vector.shape_cast %63 : vector<16x16xf32> to vector<1x16x16xf32>
    tpu.vector_store %arg8[%c0_36, %c16, %c0_37], %66 {strides = array<i32>} : memref<1x64x16xf32, #tpu.memory_space<vmem>>, vector<1x16x16xf32>,
    %67 = arith.mulf %62, %5 : vector<16x16xf32>
    %c0_38 = arith.constant 0 : index
    %c16_39 = arith.constant 16 : index
    %c0_40 = arith.constant 0 : index
    %68 = vector.load %arg9[%c0_38, %c16_39, %c0_40] : memref<1x64x16xf32, #tpu.memory_space<vmem>>, vector<1x16x16xf32>
    %69 = vector.shape_cast %68 : vector<1x16x16xf32> to vector<16x16xf32>
    %70 = vector.shape_cast %67 : vector<16x16xf32> to vector<1x16x16xf32>
    tpu.vector_store %arg9[%c0_38, %c16_39, %c0_40], %70 {strides = array<i32>} : memref<1x64x16xf32, #tpu.memory_space<vmem>>, vector<1x16x16xf32>,
    %71 = vector.extract_strided_slice %33 {offsets = [32, 0], sizes = [16, 16], strides = [1, 1]} : vector<64x16xf32> to vector<16x16xf32>
    %72 = vector.extract_strided_slice %35 {offsets = [32, 0], sizes = [16, 16], strides = [1, 1]} : vector<64x16xf32> to vector<16x16xf32>
    %cst_41 = arith.constant dense<0.000000e+00> : vector<16x16xf32>
    %73 = tpu.matmul %10, %71, %cst_41 {dimension_numbers = #tpu.dot_dimension_numbers<[1], [0], [0], [1], [0, 0, 1, 1], [], []>, precision = #tpu.contract_precision<fp32>} : vector<16x16xf32>, vector<16x16xf32>, vector<16x16xf32> -> vector<16x16xf32>
    %cst_42 = arith.constant dense<0.000000e+00> : vector<16x16xf32>
    %74 = tpu.matmul %11, %72, %cst_42 {dimension_numbers = #tpu.dot_dimension_numbers<[1], [0], [0], [1], [0, 0, 1, 1], [], []>, precision = #tpu.contract_precision<fp32>} : vector<16x16xf32>, vector<16x16xf32>, vector<16x16xf32> -> vector<16x16xf32>
    %75 = arith.addf %71, %72 : vector<16x16xf32>
    %cst_43 = arith.constant dense<0.000000e+00> : vector<16x16xf32>
    %76 = tpu.matmul %36, %75, %cst_43 {dimension_numbers = #tpu.dot_dimension_numbers<[1], [0], [0], [1], [0, 0, 1, 1], [], []>, precision = #tpu.contract_precision<fp32>} : vector<16x16xf32>, vector<16x16xf32>, vector<16x16xf32> -> vector<16x16xf32>
    %77 = arith.subf %73, %74 : vector<16x16xf32>
    %78 = arith.subf %76, %73 : vector<16x16xf32>
    %79 = arith.subf %78, %74 : vector<16x16xf32>
    %80 = arith.mulf %77, %5 : vector<16x16xf32>
    %c0_44 = arith.constant 0 : index
    %c32 = arith.constant 32 : index
    %c0_45 = arith.constant 0 : index
    %81 = vector.load %arg8[%c0_44, %c32, %c0_45] : memref<1x64x16xf32, #tpu.memory_space<vmem>>, vector<1x16x16xf32>
    %82 = vector.shape_cast %81 : vector<1x16x16xf32> to vector<16x16xf32>
    %83 = vector.shape_cast %80 : vector<16x16xf32> to vector<1x16x16xf32>
    tpu.vector_store %arg8[%c0_44, %c32, %c0_45], %83 {strides = array<i32>} : memref<1x64x16xf32, #tpu.memory_space<vmem>>, vector<1x16x16xf32>,
    %84 = arith.mulf %79, %5 : vector<16x16xf32>
    %c0_46 = arith.constant 0 : index
    %c32_47 = arith.constant 32 : index
    %c0_48 = arith.constant 0 : index
    %85 = vector.load %arg9[%c0_46, %c32_47, %c0_48] : memref<1x64x16xf32, #tpu.memory_space<vmem>>, vector<1x16x16xf32>
    %86 = vector.shape_cast %85 : vector<1x16x16xf32> to vector<16x16xf32>
    %87 = vector.shape_cast %84 : vector<16x16xf32> to vector<1x16x16xf32>
    tpu.vector_store %arg9[%c0_46, %c32_47, %c0_48], %87 {strides = array<i32>} : memref<1x64x16xf32, #tpu.memory_space<vmem>>, vector<1x16x16xf32>,
    %88 = vector.extract_strided_slice %33 {offsets = [48, 0], sizes = [16, 16], strides = [1, 1]} : vector<64x16xf32> to vector<16x16xf32>
    %89 = vector.extract_strided_slice %35 {offsets = [48, 0], sizes = [16, 16], strides = [1, 1]} : vector<64x16xf32> to vector<16x16xf32>
    %cst_49 = arith.constant dense<0.000000e+00> : vector<16x16xf32>
    %90 = tpu.matmul %10, %88, %cst_49 {dimension_numbers = #tpu.dot_dimension_numbers<[1], [0], [0], [1], [0, 0, 1, 1], [], []>, precision = #tpu.contract_precision<fp32>} : vector<16x16xf32>, vector<16x16xf32>, vector<16x16xf32> -> vector<16x16xf32>
    %cst_50 = arith.constant dense<0.000000e+00> : vector<16x16xf32>
    %91 = tpu.matmul %11, %89, %cst_50 {dimension_numbers = #tpu.dot_dimension_numbers<[1], [0], [0], [1], [0, 0, 1, 1], [], []>, precision = #tpu.contract_precision<fp32>} : vector<16x16xf32>, vector<16x16xf32>, vector<16x16xf32> -> vector<16x16xf32>
    %92 = arith.addf %88, %89 : vector<16x16xf32>
    %cst_51 = arith.constant dense<0.000000e+00> : vector<16x16xf32>
    %93 = tpu.matmul %36, %92, %cst_51 {dimension_numbers = #tpu.dot_dimension_numbers<[1], [0], [0], [1], [0, 0, 1, 1], [], []>, precision = #tpu.contract_precision<fp32>} : vector<16x16xf32>, vector<16x16xf32>, vector<16x16xf32> -> vector<16x16xf32>
    %94 = arith.subf %90, %91 : vector<16x16xf32>
    %95 = arith.subf %93, %90 : vector<16x16xf32>
    %96 = arith.subf %95, %91 : vector<16x16xf32>
    %97 = arith.mulf %94, %5 : vector<16x16xf32>
    %c0_52 = arith.constant 0 : index
    %c48 = arith.constant 48 : index
    %c0_53 = arith.constant 0 : index
    %98 = vector.load %arg8[%c0_52, %c48, %c0_53] : memref<1x64x16xf32, #tpu.memory_space<vmem>>, vector<1x16x16xf32>
    %99 = vector.shape_cast %98 : vector<1x16x16xf32> to vector<16x16xf32>
    %100 = vector.shape_cast %97 : vector<16x16xf32> to vector<1x16x16xf32>
    tpu.vector_store %arg8[%c0_52, %c48, %c0_53], %100 {strides = array<i32>} : memref<1x64x16xf32, #tpu.memory_space<vmem>>, vector<1x16x16xf32>,
    %101 = arith.mulf %96, %5 : vector<16x16xf32>
    %c0_54 = arith.constant 0 : index
    %c48_55 = arith.constant 48 : index
    %c0_56 = arith.constant 0 : index
    %102 = vector.load %arg9[%c0_54, %c48_55, %c0_56] : memref<1x64x16xf32, #tpu.memory_space<vmem>>, vector<1x16x16xf32>
    %103 = vector.shape_cast %102 : vector<1x16x16xf32> to vector<16x16xf32>
    %104 = vector.shape_cast %101 : vector<16x16xf32> to vector<1x16x16xf32>
    tpu.vector_store %arg9[%c0_54, %c48_55, %c0_56], %104 {strides = array<i32>} : memref<1x64x16xf32, #tpu.memory_space<vmem>>, vector<1x16x16xf32>,
    return
  }
  func.func @transform_0(%arg0: i32) -> (i32, i32, i32) {
    %c0_i32 = arith.constant 0 : i32
    %c0_i32_0 = arith.constant 0 : i32
    %c0_i32_1 = arith.constant 0 : i32
    return %arg0, %c0_i32, %c0_i32_0 : i32, i32, i32
  }
  func.func @transform_1(%arg0: i32) -> (i32, i32, i32) {
    %c0_i32 = arith.constant 0 : i32
    %c0_i32_0 = arith.constant 0 : i32
    %c0_i32_1 = arith.constant 0 : i32
    return %arg0, %c0_i32, %c0_i32_0 : i32, i32, i32
  }
  func.func @transform_2(%arg0: i32) -> (i32, i32, i32) {
    %c0_i32 = arith.constant 0 : i32
    %c0_i32_0 = arith.constant 0 : i32
    %c0_i32_1 = arith.constant 0 : i32
    return %arg0, %c0_i32, %c0_i32_0 : i32, i32, i32
  }
  func.func @transform_3(%arg0: i32) -> (i32, i32, i32) {
    %c0_i32 = arith.constant 0 : i32
    %c0_i32_0 = arith.constant 0 : i32
    %c0_i32_1 = arith.constant 0 : i32
    return %arg0, %c0_i32, %c0_i32_0 : i32, i32, i32
  }
  func.func @transform_4(%arg0: i32) -> (i32, i32, i32) {
    %c0_i32 = arith.constant 0 : i32
    %c0_i32_0 = arith.constant 0 : i32
    %c0_i32_1 = arith.constant 0 : i32
    return %arg0, %c0_i32, %c0_i32_0 : i32, i32, i32
  }
  func.func @transform_5(%arg0: i32) -> (i32, i32) {
    %c0_i32 = arith.constant 0 : i32
    %c0_i32_0 = arith.constant 0 : i32
    %c0_i32_1 = arith.constant 0 : i32
    return %c0_i32, %c0_i32_0 : i32, i32
  }
  func.func @transform_6(%arg0: i32) -> (i32, i32) {
    %c0_i32 = arith.constant 0 : i32
    %c0_i32_0 = arith.constant 0 : i32
    %c0_i32_1 = arith.constant 0 : i32
    return %c0_i32, %c0_i32_0 : i32, i32
  }
  func.func @transform_7(%arg0: i32) -> (i32, i32, i32) {
    %c0_i32 = arith.constant 0 : i32
    %c0_i32_0 = arith.constant 0 : i32
    %c0_i32_1 = arith.constant 0 : i32
    return %arg0, %c0_i32, %c0_i32_0 : i32, i32, i32
  }
  func.func @transform_8(%arg0: i32) -> (i32, i32, i32) {
    %c0_i32 = arith.constant 0 : i32
    %c0_i32_0 = arith.constant 0 : i32
    %c0_i32_1 = arith.constant 0 : i32
    return %arg0, %c0_i32, %c0_i32_0 : i32, i32, i32
  }
}

</mosaic_0001>

<bundles_post_ra>
// kernel: tpu_custom_call.1
= control target key start
LH: loop header
LB: loop body
LE: loop exit
PB: predicated region body
PF: predicated region fallthrough
CT: control target
= control target key end

     0   :  { %s11052_s27 = smov 0   ;;  %s12391_s0 = inlined_call_operand.vmem [shape: f32[2,16,16], index: 0, kind: input, shape index: {}]   ;;  %s12392_s1 = inlined_call_operand.vmem [shape: f32[2,16,16], index: 1, kind: input, shape index: {}]   ;;  %s12393_s2 = inlined_call_operand.vmem [shape: f32[2,64,16], index: 2, kind: input, shape index: {}]   ;;  %s12394_s3 = inlined_call_operand.vmem [shape: f32[2,64,16], index: 3, kind: input, shape index: {}]   ;;  %s12395_s4 = inlined_call_operand.vmem [shape: f32[2,16,16], index: 4, kind: input, shape index: {}]   ;;  %s12396_s5 = inlined_call_operand.vmem [shape: f32[16,16], index: 5, kind: input, shape index: {}]   ;;  %s12397_s6 = inlined_call_operand.vmem [shape: f32[16,16], index: 6, kind: input, shape index: {}]   ;;  %s12398_s7 = inlined_call_operand.vmem [shape: f32[2,64,16], index: 7, kind: output, shape index: {0}]   ;;  %s12399_s8 = inlined_call_operand.vmem [shape: f32[2,64,16], index: 8, kind: output, shape index: {1}]  }
   0x1 LB: > { %s9102_s28 = sadd.s32 4294967295, %s11005_s27   ;;  %p9106_p0 = scmp.ge.s32.totalorder %s11005_s27, 1  ;;  %s11005_s27 = sphi %s11052_s27, %s19_s27  }
   0x2   : > { %p305_p1 = scmp.lt.s32.totalorder %s11005_s27, 3 }
   0x4   : > { %p306_p2 = pnand %p9106_p0, %p305_p1 }
   0x6   : > { %309 = sbr.rel (%p306_p2) target bundleno = 984 (0x3d8), region = 48 }
   0xd   : > { %v11063_v0 = vld [vmem:[%s12396_s5] sm:$0xff]  ;;  %v11068_v1 = vld [vmem:[%s12396_s5 + $0x8] sm:$0xff]  ;;  %p364_p3 = scmp.lt.s32.totalorder %s9102_s28, 1  ;;  %vm473_vm0 = vcmask 130048  }
   0xe   : > { %12440 = vst [vmem:[#allocation2_spill] sm:$0xff] %v11063_v0  ;;  %12441 = vst [vmem:[#allocation3_spill] sm:$0xff] %v11068_v1  ;;  %v11073_v2 = vld [vmem:[%s12397_s6] sm:$0xff]  ;;  %v499_v3 = vand.u32 4294901760, %v11063_v0  ;;  %v502_v4 = vand.u32 4294901760, %v11068_v1  ;;  %v11080_v5 = vld [vmem:[%s12397_s6 + $0x8] sm:$0xff] }
   0xf   : > { %12442 = vst [vmem:[#allocation4_spill] sm:$0xff] %v11073_v2  ;;  %12443 = vst [vmem:[#allocation5_spill] sm:$0xff] %v11080_v5  ;;  %v1283_v6 = vand.u32 4294901760, %v11073_v2  ;;  %v1286_v7 = vand.u32 4294901760, %v11080_v5  ;;  %s12497_s28 = smov (!%p364_p3, %s9102_s28), 1 }
  0x10   : > { %v11084_v8 = vpack.c.bf16 %v502_v4, %v499_v3  ;;  %v11087_v9 = vsub.f32 %v11063_v0, %v499_v3  ;;  %v11090_v10 = vsub.f32 %v11068_v1, %v502_v4  ;;  %s11097_s15 = sshll.u32 %s12497_s28, 4  ;;  %s11099_s16 = sshll.u32 %s12497_s28, 6 }
  0x11   : > { %v11093_v11 = vsub.f32 %v11073_v2, %v1283_v6  ;;  %v11095_v12 = vpack.c.bf16 %v1286_v7, %v1283_v6  ;;  %v11102_v13 = vsub.f32 %v11080_v5, %v1286_v7  ;;  %s368_s19 = scalar_lea.vmem %s12391_s0, %s11097_s15  ;;  %s373_s22 = scalar_lea.vmem %s12392_s1, %s11097_s15 }
  0x12   : > { %10391 = vmatprep.subr.bf16.mxu0 %v11084_v8  ;;  %v12409_v14 = vand.u32 4294901760, %v11087_v9  ;;  %s11120_s25 = scalar_lea.vmem %s12393_s2, %s11099_s16  ;;  %s11126_s29 = scalar_lea.vmem %s12394_s3, %s11099_s16  ;;  %v11128_v15 = vld [vmem:[%s368_s19] sm:$0xff]  ;;  %v11130_v16 = vld [vmem:[%s368_s19 + $0x8] sm:$0xff]  ;;  %v12408_v18 = vand.u32 4294901760, %v11090_v10  ;;  %v11149_v25 = vpack.c.bf16 %v11090_v10, %v11087_v9 }
  0x13   : > { %10415 = vmatprep.subr.bf16.mxu1 %v11095_v12  ;;  %10393 = vmatpush3.bf16.msra.mxu0 %v11084_v8  ;;  %v11132_v17 = vld [vmem:[%s373_s22] sm:$0xff]  ;;  %v11136_v19 = vld [vmem:[%s373_s22 + $0x8] sm:$0xff]  ;;  %v12407_v23 = vand.u32 4294901760, %v11093_v11  ;;  %v407_v32 = vld [vmem:[%s11120_s25 + $0x10] sm:$0xff]  ;;  %s388_s12 = scalar_lea.vmem %s12395_s4, %s11097_s15  ;;  %s12302_s17 = scalar_lea.vmem %s12398_s7, %s11099_s16 }
  0x14   : > { %10417 = vmatpush3.bf16.msra.mxu1 %v11095_v12  ;;  %v405_v20 = vld [vmem:[%s11120_s25] sm:$0xff]  ;;  %v11143_v22 = vsub.f32 %v11087_v9, %v12409_v14  ;;  %v406_v30 = vld [vmem:[%s11120_s25 + $0x8] sm:$0xff]  ;;  %v415_v37 = vld [vmem:[%s11126_s29 + $0x10] sm:$0xff]  ;;  %v427_v40 = vmul.f32 %v407_v32, %v11128_v15  ;;  %v451_v44 = vmul.f32 %v407_v32, %v11132_v17  ;;  %v656_v7 = vsub.f32 %v11090_v10, %v12408_v18  ;;  %s12343_s19 = scalar_lea.vmem %s12399_s8, %s11099_s16 }
  0x15   : > { %v413_v21 = vld [vmem:[%s11126_s29] sm:$0xff]  ;;  %v425_v26 = vmul.f32 %v405_v20, %v11128_v15  ;;  %v449_v28 = vmul.f32 %v405_v20, %v11132_v17  ;;  %v414_v31 = vld [vmem:[%s11126_s29 + $0x8] sm:$0xff]  ;;  %v426_v33 = vmul.f32 %v406_v30, %v11130_v16  ;;  %v450_v35 = vmul.f32 %v406_v30, %v11136_v19  ;;  %v408_v54 = vld [vmem:[%s11120_s25 + $0x18] sm:$0xff] }
  0x16   : > { %v433_v27 = vmul.f32 %v413_v21, %v11132_v17  ;;  %v457_v29 = vmul.f32 %v413_v21, %v11128_v15  ;;  %v434_v34 = vmul.f32 %v414_v31, %v11136_v19  ;;  %v458_v36 = vmul.f32 %v414_v31, %v11130_v16  ;;  %v416_v63 = vld [vmem:[%s11126_s29 + $0x18] sm:$0xff] }
  0x17   : > { %v435_v41 = vmul.f32 %v415_v37, %v11132_v17  ;;  %v459_v45 = vmul.f32 %v415_v37, %v11128_v15  ;;  %v428_v6 = vmul.f32 %v408_v54, %v11130_v16  ;;  %v436_v31 = vmul.f32 %v416_v63, %v11136_v19 }
  0x18   : > { %v441_v38 = vsub.f32 %v425_v26, %v433_v27  ;;  %v465_v39 = vadd.f32 %v457_v29, %v449_v28  ;;  %v442_v42 = vsub.f32 %v426_v33, %v434_v34  ;;  %v466_v43 = vadd.f32 %v458_v36, %v450_v35 }
  0x19   : > { %v11171_v49 = vsub.f32 %v427_v40, %v435_v41  ;;  %v11196_v62 = vadd.f32 %v459_v45, %v451_v44  ;;  %v11217_v27 = vsub.f32 %v11093_v11, %v12407_v23  ;;  %v409_v44 = vld [vmem:[%s11120_s25 + $0x20] sm:$0xff] }
  0x1a   : > { %v475_v46 = vsel %vm473_vm0, %v441_v38, 0  ;;  %v1259_v47 = vsel %vm473_vm0, %v465_v39, 0  ;;  %v11169_v48 = vadd.f32 %v465_v39, %v441_v38  ;;  %v478_v52 = vsel %vm473_vm0, %v442_v42, 0 }
  0x1b   : > { %v11173_v50 = vand.u32 4294901760, %v475_v46  ;;  %v11175_v51 = vand.u32 4294901760, %v1259_v47  ;;  %v1262_v53 = vsel %vm473_vm0, %v466_v43, 0  ;;  %v11180_v55 = vand.u32 4294901760, %v478_v52 }
  0x1c   : > { %12444 = vst [vmem:[#allocation6_spill] sm:$0xff] %v11169_v48  ;;  %v11182_v56 = vand.u32 4294901760, %v1262_v53  ;;  %v11184_v57 = vadd.f32 %v466_v43, %v442_v42  ;;  %v481_v58 = vsel %vm473_vm0, %v11171_v49, 0  ;;  %v1265_v30 = vsel %vm473_vm0, %v11196_v62, 0 }
  0x1d   : > { %v11189_v59 = vsub.f32 %v475_v46, %v11173_v50  ;;  %v11192_v60 = vsub.f32 %v1259_v47, %v11175_v51  ;;  %v11194_v61 = vand.u32 4294901760, %v481_v58  ;;  %v11200_v3 = vsub.f32 %v478_v52, %v11180_v55 }
  0x1e   : > { %12445 = vst [vmem:[#allocation7_spill] sm:$0xff] %v11184_v57  ;;  %v11203_v4 = vsub.f32 %v1262_v53, %v11182_v56  ;;  %v11231_v35 = vand.u32 4294901760, %v1265_v30  ;;  %v11239_v38 = vsub.f32 %v428_v6, %v436_v31  ;;  %v650_v39 = vand.u32 4294901760, %v11143_v22  ;;  %v417_v53 = vld [vmem:[%s11126_s29 + $0x20] sm:$0xff] }
  0x1f   : > { %v12406_v20 = vand.u32 4294901760, %v11189_v59  ;;  %v12404_v21 = vand.u32 4294901760, %v11192_v60  ;;  %v11212_v26 = vsub.f32 %v481_v58, %v11194_v61  ;;  %v12405_v28 = vand.u32 4294901760, %v11200_v3 }
  0x20   : > { %v12401_v29 = vand.u32 4294901760, %v11203_v4  ;;  %v11246_v43 = vsub.f32 %v1265_v30, %v11231_v35  ;;  %v484_v47 = vsel %vm473_vm0, %v11239_v38, 0  ;;  %v657_v52 = vand.u32 4294901760, %v656_v7  ;;  %v418_v30 = vld [vmem:[%s11126_s29 + $0x28] sm:$0xff] }
  0x21   : > { %v568_v32 = vsub.f32 %v11189_v59, %v12406_v20  ;;  %v1352_v33 = vsub.f32 %v11192_v60, %v12404_v21  ;;  %v12403_v34 = vand.u32 4294901760, %v11212_v26  ;;  %v578_v36 = vsub.f32 %v11200_v3, %v12405_v28  ;;  %v412_v21 = vld [vmem:[%s11120_s25 + $0x38] sm:$0xff] }
  0x22   : > { %v1362_v37 = vsub.f32 %v11203_v4, %v12401_v29  ;;  %v12400_v58 = vand.u32 4294901760, %v11246_v43  ;;  %v11253_v6 = vand.u32 4294901760, %v484_v47  ;;  %v452_v31 = vmul.f32 %v408_v54, %v11136_v19 }
  0x23   : > { %v569_v40 = vand.u32 4294901760, %v568_v32  ;;  %v1353_v41 = vand.u32 4294901760, %v1352_v33  ;;  %v588_v42 = vsub.f32 %v11212_v26, %v12403_v34  ;;  %v579_v45 = vand.u32 4294901760, %v578_v36  ;;  %v410_v32 = vld [vmem:[%s11120_s25 + $0x28] sm:$0xff] }
  0x24   : > { %v1363_v46 = vand.u32 4294901760, %v1362_v37  ;;  %v10394_v33 = vpack.c.bf16 %v657_v52, %v650_v39  ;;  %v460_v36 = vmul.f32 %v416_v63, %v11130_v16  ;;  %v429_v7 = vmul.f32 %v409_v44, %v11128_v15  ;;  %v411_v52 = vld [vmem:[%s11120_s25 + $0x30] sm:$0xff] }
  0x25   : > { %9602 = vmatprep.mubr.f32.mxu0 %v569_v40  ;;  %9698 = vmatprep.mubr.f32.mxu1 %v1353_v41  ;;  %v589_v22 = vand.u32 4294901760, %v588_v42  ;;  %v1372_v40 = vsub.f32 %v11246_v43, %v12400_v58  ;;  %v11265_v41 = vsub.f32 %v484_v47, %v11253_v6  ;;  %v437_v54 = vmul.f32 %v417_v53, %v11132_v17 }
  0x26   : > { %9603 = vmatmul.mubr.f32.vlgmr.msra.gmra.mrb[0].mxu0 %v579_v45  ;;  %9699 = vmatmul.mubr.f32.vlgmr.msra.gmra.mrb[0].mxu1 %v1363_v46  ;;  %v453_v42 = vmul.f32 %v409_v44, %v11132_v17  ;;  %v11269_v39 = vadd.f32 %v460_v36, %v452_v31  ;;  %v461_v63 = vmul.f32 %v417_v53, %v11128_v15 }
  0x27   : > { %9605 = vmatprep.mubr.f32.mxu0 %v589_v22  ;;  %10395 = vmatprep.subr.bf16.mxu0 %v10394_v33  ;;  %v430_v45 = vmul.f32 %v410_v32, %v11130_v16  ;;  %v438_v46 = vmul.f32 %v418_v30, %v11136_v19  ;;  %v1373_v22 = vand.u32 4294901760, %v1372_v40  ;;  %v12402_v58 = vand.u32 4294901760, %v11265_v41  ;;  %v419_v40 = vld [vmem:[%s11126_s29 + $0x30] sm:$0xff] }
  0x28   : > { %10397 = vmatpush3.bf16.msra.mxu0 %v10394_v33  ;;  %v11276_v47 = vsub.f32 %v429_v7, %v437_v54  ;;  %v454_v29 = vmul.f32 %v410_v32, %v11136_v19  ;;  %v1268_v44 = vsel %vm473_vm0, %v11269_v39, 0  ;;  %v11281_v31 = vadd.f32 %v461_v63, %v453_v42 }
  0x29   : > { %v11283_v53 = vsub.f32 %v430_v45, %v438_v46  ;;  %v462_v36 = vmul.f32 %v418_v30, %v11130_v16  ;;  %10399 = vmatprep.subr.bf16.mxu0 %v11149_v25  ;;  %9701 = vmatprep.mubr.f32.mxu1 %v1373_v22  ;;  %v598_v33 = vsub.f32 %v11265_v41, %v12402_v58  ;;  %v11290_v7 = vand.u32 4294901760, %v1268_v44 }
  0x2a   : > { %v487_v32 = vsel %vm473_vm0, %v11276_v47, 0  ;;  %v431_v54 = vmul.f32 %v411_v52, %v11128_v15  ;;  %v1271_v30 = vsel %vm473_vm0, %v11281_v31, 0  ;;  %v439_v23 = vmul.f32 %v419_v40, %v11132_v17 }
  0x2b   : > { %v11296_v42 = vand.u32 4294901760, %v487_v32  ;;  %v490_v63 = vsel %vm473_vm0, %v11283_v53, 0  ;;  %v11302_v45 = vadd.f32 %v462_v36, %v454_v29  ;;  %v599_v46 = vand.u32 4294901760, %v598_v33 }
  0x2c   : > { %v11305_v22 = vsub.f32 %v1268_v44, %v11290_v7  ;;  %v11307_v58 = vand.u32 4294901760, %v1271_v30  ;;  %v11309_v34 = vand.u32 4294901760, %v490_v63  ;;  %v455_v29 = vmul.f32 %v411_v52, %v11132_v17 }
  0x2d   : > { %v11313_v28 = vsub.f32 %v487_v32, %v11296_v42  ;;  %v1274_v20 = vsel %vm473_vm0, %v11302_v45, 0  ;;  %9606 = vmatmul.mubr.f32.gmra.mrb[2].mxu0 %v599_v46  ;;  %v420_v32 = vld [vmem:[%s11126_s29 + $0x38] sm:$0xff]  ;;  %v11330_v37 = vsub.f32 %v431_v54, %v439_v23  ;;  %v463_v24 = vmul.f32 %v419_v40, %v11128_v15 }
  0x2e   : > { %v12410_v36 = vand.u32 4294901760, %v11305_v22  ;;  %v11321_v44 = vsub.f32 %v1271_v30, %v11307_v58  ;;  %v11324_v33 = vsub.f32 %v490_v63, %v11309_v34  ;;  %v11326_v18 = vand.u32 4294901760, %v1274_v20 }
  0x2f   : > { %v12414_v14 = vand.u32 4294901760, %v11313_v28  ;;  %v432_v17 = vmul.f32 %v412_v21, %v11130_v16  ;;  %v493_v15 = vsel %vm473_vm0, %v11330_v37, 0  ;;  %v471_v40 = vadd.f32 %v463_v24, %v455_v29 }
  0x30   : > { %12446 = vst [vmem:[#allocation8_spill] sm:$0xff] %v11321_v44  ;;  %v1382_v52 = vsub.f32 %v11305_v22, %v12410_v36  ;;  %v12417_v30 = vand.u32 4294901760, %v11321_v44  ;;  %v12418_v63 = vand.u32 4294901760, %v11324_v33  ;;  %v11340_v46 = vsub.f32 %v1274_v20, %v11326_v18 }
  0x31   : > { %v608_v23 = vsub.f32 %v11313_v28, %v12414_v14  ;;  %v440_v54 = vmul.f32 %v420_v32, %v11136_v19  ;;  %v11355_v1 = vand.u32 4294901760, %v493_v15  ;;  %v1277_v14 = vsel %vm473_vm0, %v471_v40, 0 }
  0x32   : > { %v1383_v57 = vand.u32 4294901760, %v1382_v52  ;;  %v1392_v36 = vsub.f32 %v11321_v44, %v12417_v30  ;;  %v618_v20 = vsub.f32 %v11324_v33, %v12418_v63  ;;  %v12423_v48 = vand.u32 4294901760, %v11340_v46 }
  0x33   : > { %v609_v5 = vand.u32 4294901760, %v608_v23  ;;  %v448_v2 = vsub.f32 %v432_v17, %v440_v54  ;;  %v11361_v30 = vand.u32 4294901760, %v1277_v14  ;;  %v11364_v63 = vsub.f32 %v493_v15, %v11355_v1 }
  0x34   : > { %9702 = vmatmul.mubr.f32.gmra.mrb[2].mxu1 %v1383_v57  ;;  %v1393_v24 = vand.u32 4294901760, %v1392_v36  ;;  %v619_v29 = vand.u32 4294901760, %v618_v20  ;;  %v1402_v52 = vsub.f32 %v11340_v46, %v12423_v48  ;;  %v456_v0 = vmul.f32 %v412_v21, %v11136_v19 }
  0x35   : > { %9608 = vmatprep.mubr.f32.mxu0 %v609_v5  ;;  %v496_v23 = vsel %vm473_vm0, %v448_v2, 0  ;;  %v464_v44 = vmul.f32 %v420_v32, %v11130_v16  ;;  %v11370_v36 = vsub.f32 %v1277_v14, %v11361_v30  ;;  %v12447_v54 = vand.u32 4294901760, %v11102_v13 }
  0x36   : > { %9704 = vmatprep.mubr.f32.mxu1 %v1393_v24  ;;  %9609 = vmatmul.mubr.f32.gmra.mrb[4].mxu0 %v619_v29  ;;  %v1403_v57 = vand.u32 4294901760, %v1402_v52  ;;  %v11372_v17 = vand.u32 4294901760, %v496_v23  ;;  %v12424_v15 = vand.u32 4294901760, %v11364_v63  ;;  %v10422_v24 = vpack.c.bf16 %v11102_v13, %v11093_v11 }
  0x37   : > { %v1440_v5 = vsub.f32 %v11102_v13, %v12447_v54  ;;  %v472_v20 = vadd.f32 %v464_v44, %v456_v0  ;;  %v12425_v19 = vand.u32 4294901760, %v11370_v36  ;;  %v12448_v52 = vand.u32 4294901760, %v11217_v27 }
  0x38   : > { %9705 = vmatmul.mubr.f32.gmra.mrb[4].mxu1 %v1403_v57  ;;  %v11380_v16 = vsub.f32 %v496_v23, %v11372_v17  ;;  %v628_v14 = vsub.f32 %v11364_v63, %v12424_v15  ;;  %v11398_v54 = vadd.f32 %v11196_v62, %v11171_v49 }
  0x39   : > { %v1441_v21 = vand.u32 4294901760, %v1440_v5  ;;  %v1280_v32 = vsel %vm473_vm0, %v472_v20, 0  ;;  %v1412_v0 = vsub.f32 %v11370_v36, %v12425_v19  ;;  %v11408_v19 = vadd.f32 %v11269_v39, %v11239_v38 }
  0x3a   : > { %v637_v44 = vand.u32 4294901760, %v11380_v16  ;;  %v11392_v29 = vand.u32 4294901760, %v1280_v32  ;;  %v629_v57 = vand.u32 4294901760, %v628_v14  ;;  %v11421_v38 = vadd.f32 %v11302_v45, %v11283_v53 }
  0x3b   : > { %v10418_v23 = vpack.c.bf16 %v1441_v21, %v12448_v52  ;;  %v1413_v5 = vand.u32 4294901760, %v1412_v0  ;;  %v11416_v21 = vadd.f32 %v11281_v31, %v11276_v47  ;;  %v11429_v14 = vadd.f32 %v472_v20, %v448_v2  ;;  %v12465_v0 = vld [vmem:[#allocation5_spill] sm:$0xff] }
  0x3c   : > { %v638_v48 = vsub.f32 %v11380_v16, %v637_v44  ;;  %v11404_v15 = vsub.f32 %v1280_v32, %v11392_v29  ;;  %9611 = vmatprep.mubr.f32.mxu0 %v629_v57  ;;  %v12449_v2 = vand.u32 4294901760, %v11087_v9  ;;  %v12451_v47 = vand.u32 4294901760, %v11093_v11  ;;  %v12453_v9 = vld [vmem:[#allocation8_spill] sm:$0xff] }
  0x3d   : > { %10419 = vmatprep.subr.bf16.mxu1 %v10418_v23  ;;  %9707 = vmatprep.mubr.f32.mxu1 %v1413_v5  ;;  %v12452_v31 = vand.u32 4294901760, %v11102_v13  ;;  %v12455_v11 = vand.u32 4294901760, %v11200_v3  ;;  %v12456_v13 = vand.u32 4294901760, %v11192_v60  ;;  %v12457_v45 = vand.u32 4294901760, %v11212_v26 }
  0x3e   : > { %10421 = vmatpush3.bf16.msra.mxu1 %v10418_v23  ;;  %v639_v27 = vand.u32 4294901760, %v638_v48  ;;  %v1421_v49 = vand.u32 4294901760, %v11404_v15  ;;  %v11425_v48 = vadd.f32 %v471_v40, %v11330_v37  ;;  %v12458_v40 = vand.u32 4294901760, %v11203_v4 }
  0x3f   : > { %10423 = vmatprep.subr.bf16.mxu1 %v10422_v24  ;;  %v10430_v53 = vpack.c.bf16 %v12452_v31, %v12451_v47  ;;  %v12460_v20 = vand.u32 4294901760, %v11246_v43  ;;  %v12469_v52 = vand.u32 4294901760, %v11364_v63  ;;  %v12470_v5 = vand.u32 4294901760, %v11340_v46 }
  0x40   : > { %9612 = vmatmul.mubr.f32.gmra.mrb[6].mxu0 %v639_v27  ;;  %v1422_v62 = vsub.f32 %v11404_v15, %v1421_v49 }
  0x41   : > { %9618 = vmatprep.mubr.f32.mxu0 %v11173_v50 }
  0x42   : > { %v1423_v39 = vand.u32 4294901760, %v1422_v62  ;;  %v12473_v62 = vld [vmem:[#allocation7_spill] sm:$0xff] }
  0x44   : > { %9708 = vmatmul.mubr.f32.gmra.mrb[6].mxu1 %v1423_v39  ;;  %9619 = vmatmul.mubr.f32.vlgmr.msra.gmra.mrb[0].mxu0 %v11180_v55  ;;  %v2056_v39 = vsel %vm473_vm0, %v12473_v62, 0 }
  0x45   : > { %9714 = vmatprep.mubr.f32.mxu1 %v11175_v51  ;;  %9621 = vmatprep.mubr.f32.mxu0 %v11194_v61 }
  0x46   : > { %10401 = vmatpush3.bf16.msra.mxu0 %v11149_v25  ;;  %v12450_v25 = vand.u32 4294901760, %v11090_v10  ;;  %v12454_v10 = vand.u32 4294901760, %v11189_v59 }
  0x47   : > { %10403 = vmatprep.subr.bf16.mxu0 %v11084_v8 }
  0x48   : > { %9715 = vmatmul.mubr.f32.vlgmr.msra.gmra.mrb[0].mxu1 %v11182_v56  ;;  %9622 = vmatmul.mubr.f32.gmra.mrb[2].mxu0 %v11253_v6  ;;  %v10406_v37 = vpack.c.bf16 %v12450_v25, %v12449_v2 }
  0x49   : > { %9717 = vmatprep.mubr.f32.mxu1 %v11231_v35  ;;  %9624 = vmatprep.mubr.f32.mxu0 %v11296_v42 }
  0x4a   : > { %10425 = vmatpush3.bf16.msra.mxu1 %v10422_v24  ;;  %v12464_v24 = vld [vmem:[#allocation3_spill] sm:$0xff] }
  0x4b   : > { %10427 = vmatprep.subr.bf16.mxu1 %v11095_v12 }
  0x4c   : > { %9718 = vmatmul.mubr.f32.gmra.mrb[2].mxu1 %v11290_v7  ;;  %9625 = vmatmul.mubr.f32.gmra.mrb[4].mxu0 %v11309_v34 }
  0x4d   : > { %9720 = vmatprep.mubr.f32.mxu1 %v11307_v58  ;;  %9627 = vmatprep.mubr.f32.mxu0 %v11355_v1 }
  0x50   : > { %9721 = vmatmul.mubr.f32.gmra.mrb[4].mxu1 %v11326_v18  ;;  %9628 = vmatmul.mubr.f32.gmra.mrb[6].mxu0 %v11372_v17 }
  0x51   : > { %9723 = vmatprep.mubr.f32.mxu1 %v11361_v30  ;;  %9634 = vmatprep.mubr.f32.mxu0 %v11189_v59  ;;  %v12459_v59 = vand.u32 4294901760, %v11265_v41 }
  0x54   : > { %9724 = vmatmul.mubr.f32.gmra.mrb[6].mxu1 %v11392_v29  ;;  %9635 = vmatmul.mubr.f32.vlgmr.msra.gmra.mrb[0].mxu0 %v11200_v3  ;;  %v12461_v3 = vand.u32 4294901760, %v11313_v28 }
  0x55   : > { %9730 = vmatprep.mubr.f32.mxu1 %v11192_v60  ;;  %9637 = vmatprep.mubr.f32.mxu0 %v11212_v26  ;;  %v12462_v60 = vld [vmem:[#allocation2_spill] sm:$0xff]  ;;  %v12463_v26 = vld [vmem:[#allocation4_spill] sm:$0xff] }
  0x56   : > { %10405 = vmatpush3.bf16.msra.mxu0 %v11084_v8  ;;  %v11492_v32 = vadd.f32 %v12463_v26, %v12462_v60 }
  0x57   : > { %10407 = vmatprep.subr.bf16.mxu0 %v10406_v37 }
  0x58   : > { %9731 = vmatmul.mubr.f32.vlgmr.msra.gmra.mrb[0].mxu1 %v11203_v4  ;;  %9638 = vmatmul.mubr.f32.gmra.mrb[2].mxu0 %v11265_v41  ;;  %v11496_v4 = vadd.f32 %v12465_v0, %v12464_v24  ;;  %v12466_v41 = vand.u32 4294901760, %v11305_v22  ;;  %v2077_v23 = vand.u32 4294901760, %v11492_v32 }
  0x59   : > { %9733 = vmatprep.mubr.f32.mxu1 %v11246_v43  ;;  %9640 = vmatprep.mubr.f32.mxu0 %v11313_v28  ;;  %v12467_v43 = vand.u32 4294901760, %v11324_v33  ;;  %v12468_v28 = vand.u32 4294901760, %v12453_v9 }
  0x5a   : > { %10429 = vmatpush3.bf16.msra.mxu1 %v11095_v12  ;;  %v2080_v57 = vand.u32 4294901760, %v11496_v4 }
  0x5b   : > { %10431 = vmatprep.subr.bf16.mxu1 %v10430_v53 }
  0x5c   : > { %9734 = vmatmul.mubr.f32.gmra.mrb[2].mxu1 %v11305_v22  ;;  %9641 = vmatmul.mubr.f32.gmra.mrb[4].mxu0 %v11324_v33  ;;  %v12471_v22 = vand.u32 4294901760, %v11370_v36  ;;  %v11515_v33 = vpack.c.bf16 %v2080_v57, %v2077_v23  ;;  %v11521_v27 = vsub.f32 %v11496_v4, %v2080_v57 }
  0x5d   : > { %9736 = vmatprep.mubr.f32.mxu1 %v12453_v9  ;;  %9643 = vmatprep.mubr.f32.mxu0 %v11364_v63  ;;  %v11518_v63 = vsub.f32 %v11492_v32, %v2077_v23 }
  0x60   : > { %9737 = vmatmul.mubr.f32.gmra.mrb[4].mxu1 %v11340_v46  ;;  %9644 = vmatmul.mubr.f32.gmra.mrb[6].mxu0 %v11380_v16  ;;  %v2226_v46 = vand.u32 4294901760, %v11518_v63 }
  0x61   : > { %9739 = vmatprep.mubr.f32.mxu1 %v11370_v36  ;;  %9650 = vmatprep.mubr.f32.mxu0 %v12454_v10  ;;  %v2233_v36 = vand.u32 4294901760, %v11521_v27 }
  0x64   : > { %9740 = vmatmul.mubr.f32.gmra.mrb[6].mxu1 %v11404_v15  ;;  %9651 = vmatmul.mubr.f32.vlgmr.msra.gmra.mrb[0].mxu0 %v12455_v11  ;;  %v12472_v15 = vld [vmem:[#allocation6_spill] sm:$0xff] }
  0x65   : > { %9746 = vmatprep.mubr.f32.mxu1 %v12456_v13  ;;  %9653 = vmatprep.mubr.f32.mxu0 %v12457_v45  ;;  %v2053_v16 = vsel %vm473_vm0, %v12472_v15, 0 }
  0x66   : > { %10409 = vmatpush3.bf16.msra.mxu0 %v10406_v37  ;;  %v11555_v37 = vand.u32 4294901760, %v2056_v39 }
  0x67   : > { %10411 = vmatprep.subr.bf16.mxu0 %v11084_v8 }
  0x68   : > { %9747 = vmatmul.mubr.f32.vlgmr.msra.gmra.mrb[0].mxu1 %v12458_v40  ;;  %9654 = vmatmul.mubr.f32.gmra.mrb[2].mxu0 %v12459_v59  ;;  %v11574_v11 = vsub.f32 %v2056_v39, %v11555_v37  ;;  %v2074_v40 = vsel %vm473_vm0, %v11429_v14, 0 }
  0x69   : > { %9749 = vmatprep.mubr.f32.mxu1 %v12460_v20  ;;  %9656 = vmatprep.mubr.f32.mxu0 %v12461_v3  ;;  %v11620_v20 = vand.u32 4294901760, %v2074_v40 }
  0x6a   : > { %10433 = vmatpush3.bf16.msra.mxu1 %v10430_v53  ;;  %v2065_v53 = vsel %vm473_vm0, %v11416_v21, 0  ;;  %v2068_v21 = vsel %vm473_vm0, %v11421_v38, 0 }
  0x6b   : > { %10435 = vmatprep.subr.bf16.mxu1 %v11095_v12  ;;  %v11599_v38 = vand.u32 4294901760, %v2068_v21 }
  0x6c   : > { %9750 = vmatmul.mubr.f32.gmra.mrb[2].mxu1 %v12466_v41  ;;  %9657 = vmatmul.mubr.f32.gmra.mrb[4].mxu0 %v12467_v43  ;;  %v2214_v41 = vsub.f32 %v2074_v40, %v11620_v20 }
  0x6d   : > { %9752 = vmatprep.mubr.f32.mxu1 %v12468_v28  ;;  %9659 = vmatprep.mubr.f32.mxu0 %v12469_v52  ;;  %v11618_v59 = vsub.f32 %v2068_v21, %v11599_v38 }
  0x6e   : > { %v2215_v57 = vand.u32 4294901760, %v2214_v41 }
  0x70   : > { %9753 = vmatmul.mubr.f32.gmra.mrb[4].mxu1 %v12470_v5  ;;  %9660 = vmatmul.mubr.f32.gmra.mrb[6].mxu0 %v637_v44  ;;  %v2234_v44 = vsub.f32 %v11521_v27, %v2233_v36  ;;  %v2216_v15 = vsub.f32 %v2214_v41, %v2215_v57 }
  0x71   : > { %9755 = vmatprep.mubr.f32.mxu1 %v12471_v22  ;;  %9666 = vmatprep.mubr.f32.mxu0 %v11173_v50 }
  0x72   : > { %v2235_v25 = vand.u32 4294901760, %v2234_v44  ;;  %v3369_v44 = vsel %vm473_vm0, %v12463_v26, 0 }
  0x74   : > { %9756 = vmatmul.mubr.f32.gmra.mrb[6].mxu1 %v1421_v49  ;;  %9667 = vmatmul.mubr.f32.vlgmr.msra.gmra.mrb[0].mxu0 %v11180_v55  ;;  %v11547_v49 = vand.u32 4294901760, %v2053_v16 }
  0x75   : > { %9762 = vmatprep.mubr.f32.mxu1 %v11175_v51  ;;  %9669 = vmatprep.mubr.f32.mxu0 %v11194_v61 }
  0x76   : > { %10413 = vmatpush3.bf16.msra.mxu0 %v11084_v8  ;;  %v2227_v8 = vsub.f32 %v11518_v63, %v2226_v46  ;;  %v11560_v47 = vsub.f32 %v2053_v16, %v11547_v49 }
  0x77   : > { %10439 = vmatprep.subr.bf16.mxu0 %v11515_v33 }
  0x78   : > { %9763 = vmatmul.mubr.f32.vlgmr.msra.gmra.mrb[0].mxu1 %v11182_v56  ;;  %9670 = vmatmul.mubr.f32.gmra.mrb[2].mxu0 %v11253_v6  ;;  %v2228_v2 = vand.u32 4294901760, %v2227_v8  ;;  %v2145_v10 = vand.u32 4294901760, %v11560_v47  ;;  %v2217_v8 = vand.u32 4294901760, %v2216_v15 }
  0x79   : > { %9765 = vmatprep.mubr.f32.mxu1 %v11231_v35  ;;  %9672 = vmatprep.mubr.f32.mxu0 %v11296_v42 }
  0x7a   : > { %10437 = vmatpush3.bf16.msra.mxu1 %v11095_v12  ;;  %v2059_v12 = vsel %vm473_vm0, %v11398_v54, 0  ;;  %v2062_v54 = vsel %vm473_vm0, %v11408_v19, 0  ;;  %v10442_v9 = vpack.c.bf16 %v2235_v25, %v2228_v2  ;;  %v11583_v19 = vand.u32 4294901760, %v2065_v53 }
  0x7b   : > { %v11564_v31 = vand.u32 4294901760, %v2059_v12  ;;  %v11576_v13 = vand.u32 4294901760, %v2062_v54  ;;  %v2864_v25 = vsel %vm473_vm0, %v12464_v24, 0 }
  0x7c   : > { %9766 = vmatmul.mubr.f32.gmra.mrb[2].mxu1 %v11290_v7  ;;  %9673 = vmatmul.mubr.f32.gmra.mrb[4].mxu0 %v11309_v34 }
  0x7d   : > { %9768 = vmatprep.mubr.f32.mxu1 %v11307_v58  ;;  %9675 = vmatprep.mubr.f32.mxu0 %v11355_v1  ;;  %v11597_v45 = vsub.f32 %v2062_v54, %v11576_v13 }
  0x80   : > { %9769 = vmatmul.mubr.f32.gmra.mrb[4].mxu1 %v11326_v18  ;;  %9676 = vmatmul.mubr.f32.gmra.mrb[6].mxu0 %v11372_v17 }
  0x81   : > { %9771 = vmatprep.mubr.f32.mxu1 %v11361_v30  ;;  %9682 = vmatprep.mubr.f32.mxu0 %v11173_v50  ;;  %v11581_v50 = vsub.f32 %v2059_v12, %v11564_v31 }
  0x84   : > { %9772 = vmatmul.mubr.f32.gmra.mrb[6].mxu1 %v11392_v29  ;;  %9683 = vmatmul.mubr.f32.vlgmr.msra.gmra.mrb[0].mxu0 %v11180_v55  ;;  %v2071_v55 = vsel %vm473_vm0, %v11425_v48, 0  ;;  %v2165_v48 = vand.u32 4294901760, %v11581_v50 }
  0x85   : > { %9778 = vmatprep.mubr.f32.mxu1 %v11175_v51  ;;  %9685 = vmatprep.mubr.f32.mxu0 %v11194_v61  ;;  %v2146_v51 = vsub.f32 %v11560_v47, %v2145_v10  ;;  %v2155_v61 = vand.u32 4294901760, %v11574_v11 }
  0x86   : > { %10441 = vmatpush3.bf16.msra.mxu0 %v11515_v33 }
  0x87   : > { %10443 = vmatprep.subr.bf16.mxu0 %v10442_v9  ;;  %v2147_v14 = vand.u32 4294901760, %v2146_v51 }
  0x88   : > { %9779 = vmatmul.mubr.f32.vlgmr.msra.gmra.mrb[0].mxu1 %v11182_v56  ;;  %9686 = vmatmul.mubr.f32.gmra.mrb[2].mxu0 %v11253_v6  ;;  %v11605_v56 = vsub.f32 %v2065_v53, %v11583_v19  ;;  %v11607_v6 = vand.u32 4294901760, %v2071_v55 }
  0x89   : > { %9781 = vmatprep.mubr.f32.mxu1 %v11231_v35  ;;  %9688 = vmatprep.mubr.f32.mxu0 %v11296_v42  ;;  %v2156_v35 = vsub.f32 %v11574_v11, %v2155_v61  ;;  %v2175_v42 = vand.u32 4294901760, %v11597_v45 }
  0x8a   : > { %v2204_v3 = vsub.f32 %v2071_v55, %v11607_v6 }
  0x8b   : > { %v2157_v0 = vand.u32 4294901760, %v2156_v35 }
  0x8c   : > { %9782 = vmatmul.mubr.f32.gmra.mrb[2].mxu1 %v11290_v7  ;;  %9689 = vmatmul.mubr.f32.gmra.mrb[4].mxu0 %v11309_v34  ;;  %v2166_v34 = vsub.f32 %v11581_v50, %v2165_v48  ;;  %v2185_v7 = vand.u32 4294901760, %v11605_v56  ;;  %v2205_v52 = vand.u32 4294901760, %v2204_v3 }
  0x8d   : > { %9784 = vmatprep.mubr.f32.mxu1 %v11307_v58  ;;  %9691 = vmatprep.mubr.f32.mxu0 %v11355_v1  ;;  %v2176_v58 = vsub.f32 %v11597_v45, %v2175_v42  ;;  %v2195_v1 = vand.u32 4294901760, %v11618_v59 }
  0x8e   : > { %v2167_v43 = vand.u32 4294901760, %v2166_v34  ;;  %v2186_v28 = vsub.f32 %v11605_v56, %v2185_v7  ;;  %v2206_v22 = vsub.f32 %v2204_v3, %v2205_v52 }
  0x8f   : > { %v2196_v23 = vsub.f32 %v11618_v59, %v2195_v1 }
  0x90   : > { %9785 = vmatmul.mubr.f32.gmra.mrb[4].mxu1 %v11326_v18  ;;  %9692 = vmatmul.mubr.f32.gmra.mrb[6].mxu0 %v11372_v17  ;;  %v10446_v18 = vpack.c.bf16 %v11521_v27, %v11518_v63  ;;  %v2177_v17 = vand.u32 4294901760, %v2176_v58  ;;  %v2187_v5 = vand.u32 4294901760, %v2186_v28  ;;  %v2207_v16 = vand.u32 4294901760, %v2206_v22 }
  0x91   : > { %9787 = vmatprep.mubr.f32.mxu1 %v11361_v30  ;;  %9794 = vmatprep.mubr.f32.mxu0 %v2147_v14  ;;  %v2197_v30 = vand.u32 4294901760, %v2196_v23  ;;  %v2861_v63 = vsel %vm473_vm0, %v12462_v60, 0 }
  0x92   : > { %v11680_v27 = vand.u32 4294901760, %v2861_v63 }
  0x94   : > { %9788 = vmatmul.mubr.f32.gmra.mrb[6].mxu1 %v11392_v29  ;;  %9795 = vmatmul.mubr.f32.vlgmr.msra.gmra.mrb[8].mxu0 %v2157_v0  ;;  %v10454_v29 = vpack.c.bf16 %v2233_v36, %v2226_v46  ;;  %v11684_v46 = vsub.f32 %v2861_v63, %v11680_v27 }
  0x95   : > { %9797 = vmatprep.mubr.f32.mxu0 %v2167_v43  ;;  %10445 = vmatpush3.bf16.msra.mxu0 %v10442_v9 }
  0x96   : > { %10447 = vmatprep.subr.bf16.mxu0 %v10446_v18 }
  0x98   : > { %9798 = vmatmul.mubr.f32.gmra.mrb[10].mxu0 %v2177_v17 }
  0x99   : > { %9800 = vmatprep.mubr.f32.mxu0 %v2187_v5 }
  0x9c   : > { %9801 = vmatmul.mubr.f32.gmra.mrb[12].mxu0 %v2197_v30 }
  0x9d   : > { %9803 = vmatprep.mubr.f32.mxu0 %v2207_v16 }
  0xa0   : > { %9804 = vmatmul.mubr.f32.gmra.mrb[14].mxu0 %v2217_v8 }
  0xa1   : > { %9810 = vmatprep.mubr.f32.mxu0 %v11547_v49 }
  0xa4   : > { %9811 = vmatmul.mubr.f32.vlgmr.msra.gmra.mrb[8].mxu0 %v11555_v37 }
  0xa5   : > { %9813 = vmatprep.mubr.f32.mxu0 %v11564_v31  ;;  %10449 = vmatpush3.bf16.msra.mxu0 %v10446_v18 }
  0xa6   : > { %10451 = vmatprep.subr.bf16.mxu0 %v11515_v33 }
  0xa8   : > { %9814 = vmatmul.mubr.f32.gmra.mrb[10].mxu0 %v11576_v13 }
  0xa9   : > { %9816 = vmatprep.mubr.f32.mxu0 %v11583_v19 }
  0xac   : > { %9817 = vmatmul.mubr.f32.gmra.mrb[12].mxu0 %v11599_v38 }
  0xad   : > { %9819 = vmatprep.mubr.f32.mxu0 %v11607_v6 }
  0xb0   : > { %9820 = vmatmul.mubr.f32.gmra.mrb[14].mxu0 %v11620_v20 }
  0xb1   : > { %9826 = vmatprep.mubr.f32.mxu0 %v11560_v47 }
  0xb4   : > { %9827 = vmatmul.mubr.f32.vlgmr.msra.gmra.mrb[8].mxu0 %v11574_v11 }
  0xb5   : > { %9829 = vmatprep.mubr.f32.mxu0 %v11581_v50  ;;  %10453 = vmatpush3.bf16.msra.mxu0 %v11515_v33 }
  0xb6   : > { %10455 = vmatprep.subr.bf16.mxu0 %v10454_v29 }
  0xb8   : > { %9830 = vmatmul.mubr.f32.gmra.mrb[10].mxu0 %v11597_v45 }
  0xb9   : > { %9832 = vmatprep.mubr.f32.mxu0 %v11605_v56 }
  0xbc   : > { %9833 = vmatmul.mubr.f32.gmra.mrb[12].mxu0 %v11618_v59 }
  0xbd   : > { %9835 = vmatprep.mubr.f32.mxu0 %v2204_v3 }
  0xc0   : > { %9836 = vmatmul.mubr.f32.gmra.mrb[14].mxu0 %v2214_v41 }
  0xc1   : > { %9842 = vmatprep.mubr.f32.mxu0 %v2145_v10 }
  0xc4   : > { %9843 = vmatmul.mubr.f32.vlgmr.msra.gmra.mrb[8].mxu0 %v2155_v61 }
  0xc5   : > { %9845 = vmatprep.mubr.f32.mxu0 %v2165_v48  ;;  %10457 = vmatpush3.bf16.msra.mxu0 %v10454_v29 }
  0xc6   : > { %10459 = vmatprep.subr.bf16.mxu0 %v11515_v33 }
  0xc8   : > { %9846 = vmatmul.mubr.f32.gmra.mrb[10].mxu0 %v2175_v42 }
  0xc9   : > { %9848 = vmatprep.mubr.f32.mxu0 %v2185_v7 }
  0xcc   : > { %9849 = vmatmul.mubr.f32.gmra.mrb[12].mxu0 %v2195_v1 }
  0xcd   : > { %9851 = vmatprep.mubr.f32.mxu0 %v2205_v52 }
  0xd0   : > { %9852 = vmatmul.mubr.f32.gmra.mrb[14].mxu0 %v2215_v57 }
  0xd1   : > { %9858 = vmatprep.mubr.f32.mxu0 %v11547_v49 }
  0xd4   : > { %9859 = vmatmul.mubr.f32.vlgmr.msra.gmra.mrb[8].mxu0 %v11555_v37 }
  0xd5   : > { %9861 = vmatprep.mubr.f32.mxu0 %v11564_v31  ;;  %10461 = vmatpush3.bf16.msra.mxu0 %v11515_v33  ;;  %v11688_v33 = vand.u32 4294901760, %v11684_v46 }
  0xd7   : > { %v2936_v36 = vsub.f32 %v11684_v46, %v11688_v33 }
  0xd8   : > { %9862 = vmatmul.mubr.f32.gmra.mrb[10].mxu0 %v11576_v13 }
  0xd9   : > { %9864 = vmatprep.mubr.f32.mxu0 %v11583_v19  ;;  %v11694_v60 = vand.u32 4294901760, %v2936_v36 }
  0xdb   : > { %12474 = vst [vmem:[#allocation8_spill] sm:$0xff] %v11694_v60  ;;  %9890 = vmatprep.mubr.f32.mxu1 %v11694_v60 }
  0xdc   : > { %9865 = vmatmul.mubr.f32.gmra.mrb[12].mxu0 %v11599_v38 }
  0xdd   : > { %9867 = vmatprep.mubr.f32.mxu0 %v11607_v6 }
  0xe0   : > { %9868 = vmatmul.mubr.f32.gmra.mrb[14].mxu0 %v11620_v20 }
  0xe1   : > { %9874 = vmatprep.mubr.f32.mxu0 %v11547_v49  ;;  %v11705_v49 = vand.u32 4294901760, %v3369_v44 }
  0xe3   : > { %v11708_v62 = vsub.f32 %v3369_v44, %v11705_v49 }
  0xe4   : > { %9875 = vmatmul.mubr.f32.vlgmr.msra.gmra.mrb[8].mxu0 %v11555_v37  ;;  %v11720_v37 = vand.u32 4294901760, %v2864_v25 }
  0xe5   : > { %9877 = vmatprep.mubr.f32.mxu0 %v11564_v31  ;;  %v11711_v39 = vand.u32 4294901760, %v11708_v62 }
  0xe6   : > { %v11723_v26 = vsub.f32 %v2864_v25, %v11720_v37 }
  0xe7   : > { %v3444_v12 = vsub.f32 %v11708_v62, %v11711_v39 }
  0xe8   : > { %9878 = vmatmul.mubr.f32.gmra.mrb[10].mxu0 %v11576_v13  ;;  %v11734_v9 = vand.u32 4294901760, %v11723_v26 }
  0xe9   : > { %9880 = vmatprep.mubr.f32.mxu0 %v11583_v19  ;;  %v11715_v2 = vand.u32 4294901760, %v3444_v12 }
  0xea   : > { %v2946_v51 = vsub.f32 %v11723_v26, %v11734_v9 }
  0xec   : > { %9881 = vmatmul.mubr.f32.gmra.mrb[12].mxu0 %v11599_v38  ;;  %v11784_v34 = vand.u32 4294901760, %v2946_v51 }
  0xed   : > { %9883 = vmatprep.mubr.f32.mxu0 %v11607_v6 }
  0xee   : > { %12475 = vst [vmem:[#allocation2_spill] sm:$0xff] %v11784_v34 }
  0xf0   : > { %9884 = vmatmul.mubr.f32.gmra.mrb[14].mxu0 %v11620_v20 }
  0xf1   : > { %10058 = vmatprep.mubr.f32.mxu0 %v11715_v2 }
 0x157   : > { %v11725_v47 = vpop.f32.mrb[0].mxu0 }
 0x158   : > { %v11727_v31 = vpop.f32.mrb[1].mxu0 }
 0x15b   : > { %v11729_v54 = vpop.f32.mrb[0].mxu1  ;;  %v11731_v53 = vpop.f32.mrb[2].mxu0 }
 0x15c   : > { %v11738_v10 = vsub.f32 %v11725_v47, %v11729_v54  ;;  %v11740_v24 = vpop.f32.mrb[1].mxu1  ;;  %v11742_v11 = vpop.f32.mrb[3].mxu0 }
 0x15d   : > { %v11746_v13 = vsub.f32 %v11727_v31, %v11740_v24 }
 0x15e   : > { %v2870_v50 = vand.u32 4294901760, %v11738_v10 }
 0x15f   : > { %v2867_v19 = vand.u32 4294901760, %v11746_v13  ;;  %v11750_v21 = vpop.f32.mrb[2].mxu1  ;;  %v11752_v55 = vpop.f32.mrb[4].mxu0 }
 0x160   : > { %v11757_v61 = vsub.f32 %v11738_v10, %v2870_v50  ;;  %v11761_v45 = vsub.f32 %v11731_v53, %v11750_v21  ;;  %v11763_v38 = vpop.f32.mrb[3].mxu1  ;;  %v11765_v48 = vpop.f32.mrb[5].mxu0 }
 0x161   : > { %v11767_v56 = vpack.c.bf16 %v2870_v50, %v2867_v19  ;;  %v11770_v6 = vsub.f32 %v11746_v13, %v2867_v19  ;;  %v11774_v40 = vsub.f32 %v11742_v11, %v11763_v38 }
 0x162   : > { %v4404_v35 = vand.u32 4294901760, %v11761_v45  ;;  %v12426_v42 = vand.u32 4294901760, %v11757_v61 }
 0x163   : > { %v4401_v59 = vand.u32 4294901760, %v11774_v40  ;;  %v11779_v20 = vpop.f32.mrb[4].mxu1  ;;  %10463 = vmatprep.subr.bf16.mxu1 %v11767_v56  ;;  %v11782_v14 = vpop.f32.mrb[6].mxu0  ;;  %v12427_v7 = vand.u32 4294901760, %v11770_v6  ;;  %v10470_v36 = vpack.c.bf16 %v11757_v61, %v11770_v6 }
 0x164   : > { %v4496_v3 = vsub.f32 %v11761_v45, %v4404_v35  ;;  %v11790_v0 = vsub.f32 %v11752_v55, %v11779_v20  ;;  %v11792_v58 = vpop.f32.mrb[5].mxu1  ;;  %10465 = vmatpush3.bf16.msra.mxu1 %v11767_v56  ;;  %v11795_v1 = vpop.f32.mrb[7].mxu0  ;;  %v2964_v41 = vsub.f32 %v11757_v61, %v12426_v42 }
 0x165   : > { %v11800_v43 = vpack.c.bf16 %v4404_v35, %v4401_v59  ;;  %v4489_v28 = vsub.f32 %v11774_v40, %v4401_v59  ;;  %v11805_v52 = vsub.f32 %v11765_v48, %v11792_v58  ;;  %v2957_v18 = vsub.f32 %v11770_v6, %v12427_v7 }
 0x166   : > { %v5926_v17 = vand.u32 4294901760, %v11790_v0  ;;  %v2965_v23 = vand.u32 4294901760, %v2964_v41  ;;  %v4497_v57 = vand.u32 4294901760, %v4496_v3 }
 0x167   : > { %12476 = vst [vmem:[#allocation4_spill] sm:$0xff] %v11800_v43  ;;  %v5923_v5 = vand.u32 4294901760, %v11805_v52  ;;  %v11812_v22 = vpop.f32.mrb[6].mxu1  ;;  %9891 = vmatmul.mubr.f32.vlgmr.msra.gmra.mrb[8].mxu1 %v11784_v34  ;;  %v2958_v30 = vand.u32 4294901760, %v2957_v18  ;;  %v4490_v15 = vand.u32 4294901760, %v4489_v28  ;;  %v11815_v16 = vpack.c.bf16 %v4496_v3, %v4489_v28 }
 0x168   : > { %v6018_v8 = vsub.f32 %v11790_v0, %v5926_v17  ;;  %v11820_v29 = vsub.f32 %v11782_v14, %v11812_v22  ;;  %v11822_v63 = vpop.f32.mrb[7].mxu1  ;;  %9897 = vmatprep.mubr.f32.mxu1 %v11680_v27  ;;  %v4498_v44 = vsub.f32 %v4496_v3, %v4497_v57 }
 0x169   : > { %12477 = vst [vmem:[#allocation3_spill] sm:$0xff] %v11815_v16  ;;  %v11827_v12 = vpack.c.bf16 %v5926_v17, %v5923_v5  ;;  %v6011_v25 = vsub.f32 %v11805_v52, %v5923_v5  ;;  %v11832_v50 = vsub.f32 %v11795_v1, %v11822_v63  ;;  %v10466_v19 = vpack.c.bf16 %v2965_v23, %v2958_v30 }
 0x16a   : > { %v7448_v51 = vand.u32 4294901760, %v11820_v29  ;;  %v6019_v35 = vand.u32 4294901760, %v6018_v8  ;;  %v4491_v59 = vsub.f32 %v4489_v28, %v4490_v15  ;;  %v4499_v41 = vand.u32 4294901760, %v4498_v44 }
 0x16b   : > { %v7445_v18 = vand.u32 4294901760, %v11832_v50  ;;  %10467 = vmatprep.subr.bf16.mxu1 %v10466_v19  ;;  %v6012_v42 = vand.u32 4294901760, %v6011_v25  ;;  %v11836_v7 = vpack.c.bf16 %v6018_v8, %v6011_v25  ;;  %v11838_v3 = vpack.c.bf16 %v4497_v57, %v4490_v15 }
 0x16c   : > { %v7540_v17 = vsub.f32 %v11820_v29, %v7448_v51  ;;  %10469 = vmatpush3.bf16.msra.mxu1 %v10466_v19  ;;  %v6020_v5 = vsub.f32 %v6018_v8, %v6019_v35  ;;  %v4492_v16 = vand.u32 4294901760, %v4491_v59  ;;  %v12483_v59 = vand.u32 4294901760, %v11770_v6 }
 0x16d   : > { %12478 = vst [vmem:[#allocation5_spill] sm:$0xff] %v11838_v3  ;;  %v11841_v43 = vpack.c.bf16 %v7448_v51, %v7445_v18  ;;  %v7533_v23 = vsub.f32 %v11832_v50, %v7445_v18  ;;  %10471 = vmatprep.subr.bf16.mxu1 %v10470_v36  ;;  %v6013_v28 = vsub.f32 %v6011_v25, %v6012_v42 }
 0x16e   : > { %v11844_v30 = vpack.c.bf16 %v6019_v35, %v6012_v42  ;;  %v6021_v44 = vand.u32 4294901760, %v6020_v5  ;;  %v11846_v34 = vpack.c.bf16 %v4499_v41, %v4492_v16  ;;  %v7541_v60 = vand.u32 4294901760, %v7540_v17 }
 0x16f   : > { %12479 = vst [vmem:[#allocation6_spill] sm:$0xff] %v11841_v43  ;;  %9898 = vmatmul.mubr.f32.vlgmr.msra.gmra.mrb[8].mxu1 %v11720_v37  ;;  %v6014_v57 = vand.u32 4294901760, %v6013_v28  ;;  %v7534_v15 = vand.u32 4294901760, %v7533_v23  ;;  %v11849_v3 = vpack.c.bf16 %v7540_v17, %v7533_v23 }
 0x170   : > { %10473 = vmatpush3.bf16.msra.mxu1 %v10470_v36  ;;  %9904 = vmatprep.mubr.f32.mxu1 %v11684_v46  ;;  %v7542_v8 = vsub.f32 %v7540_v17, %v7541_v60  ;;  %v12484_v36 = vand.u32 4294901760, %v11757_v61 }
 0x171   : > { %12480 = vst [vmem:[#allocation7_spill] sm:$0xff] %v11849_v3  ;;  %10475 = vmatprep.subr.bf16.mxu1 %v11767_v56  ;;  %v11853_v19 = vpack.c.bf16 %v6021_v44, %v6014_v57  ;;  %v7535_v42 = vsub.f32 %v7533_v23, %v7534_v15  ;;  %v11855_v25 = vpack.c.bf16 %v7541_v60, %v7534_v15  ;;  %v10998_v60 = vld [vmem:[%s12397_s6 + $0x8] sm:$0xff] }
 0x172   : > { %v7543_v16 = vand.u32 4294901760, %v7542_v8  ;;  %v10478_v41 = vpack.c.bf16 %v12484_v36, %v12483_v59  ;;  %v3372_v61 = vsel %vm473_vm0, %v10998_v60, 0 }
 0x173   : > { %12481 = vst [vmem:[#allocation9_spill] sm:$0xff] %v11855_v25  ;;  %v7536_v51 = vand.u32 4294901760, %v7535_v42  ;;  %v11878_v6 = vand.u32 4294901760, %v3372_v61 }
 0x175   : > { %v11857_v35 = vpack.c.bf16 %v7543_v16, %v7536_v51  ;;  %v11881_v18 = vsub.f32 %v3372_v61, %v11878_v6 }
 0x177   : > { %12482 = vst [vmem:[#allocation10_spill] sm:$0xff] %v11857_v35  ;;  %9905 = vmatmul.mubr.f32.vlgmr.msra.gmra.mrb[8].mxu1 %v11723_v26  ;;  %v11884_v17 = vand.u32 4294901760, %v11881_v18 }
 0x178   : > { %10477 = vmatpush3.bf16.msra.mxu1 %v11767_v56  ;;  %9911 = vmatprep.mubr.f32.mxu1 %v11688_v33 }
 0x179   : > { %10479 = vmatprep.subr.bf16.mxu1 %v10478_v41  ;;  %v3454_v57 = vsub.f32 %v11881_v18, %v11884_v17 }
 0x17b   : > { %v11899_v61 = vand.u32 4294901760, %v3454_v57 }
 0x17f   : > { %9912 = vmatmul.mubr.f32.vlgmr.msra.gmra.mrb[8].mxu1 %v11734_v9 }
 0x180   : > { %10481 = vmatpush3.bf16.msra.mxu1 %v10478_v41  ;;  %9918 = vmatprep.mubr.f32.mxu1 %v11680_v27 }
 0x181   : > { %10483 = vmatprep.subr.bf16.mxu1 %v11767_v56 }
 0x187   : > { %9919 = vmatmul.mubr.f32.vlgmr.msra.gmra.mrb[8].mxu1 %v11720_v37 }
 0x188   : > { %10485 = vmatpush3.bf16.msra.mxu1 %v11767_v56  ;;  %9925 = vmatprep.mubr.f32.mxu1 %v11680_v27 }
 0x18f   : > { %9926 = vmatmul.mubr.f32.vlgmr.msra.gmra.mrb[8].mxu1 %v11720_v37 }
 0x190   : > { %9932 = vmatprep.mubr.f32.mxu1 %v11715_v2 }
 0x1b7   : > { %v9876_v56 = vpop.f32.mrb[8].mxu0 }
 0x1b8   : > { %v2845_v5 = vsub.f32 %v9876_v56, %v11725_v47  ;;  %v2790_v23 = vpop.f32.mrb[9].mxu0 }
 0x1b9   : > { %v2844_v28 = vsub.f32 %v2790_v23, %v11727_v31 }
 0x1ba   : > { %v2853_v44 = vsub.f32 %v2845_v5, %v11729_v54 }
 0x1bb   : > { %v2852_v15 = vsub.f32 %v2844_v28, %v11740_v24  ;;  %v9879_v8 = vpop.f32.mrb[10].mxu0 }
 0x1bc   : > { %v3378_v42 = vand.u32 4294901760, %v2853_v44  ;;  %v3877_v16 = vadd.f32 %v2853_v44, %v11738_v10  ;;  %v2847_v51 = vsub.f32 %v9879_v8, %v11731_v53  ;;  %v2802_v59 = vpop.f32.mrb[11].mxu0 }
 0x1bd   : > { %v3375_v36 = vand.u32 4294901760, %v2852_v15  ;;  %v3876_v47 = vadd.f32 %v2852_v15, %v11746_v13  ;;  %v2846_v41 = vsub.f32 %v2802_v59, %v11742_v11 }
 0x1be   : > { %v11896_v31 = vsub.f32 %v2853_v44, %v3378_v42  ;;  %v3888_v54 = vand.u32 4294901760, %v3877_v16  ;;  %v2855_v60 = vsub.f32 %v2847_v51, %v11750_v21 }
 0x1bf   : > { %v11901_v24 = vpack.c.bf16 %v3378_v42, %v3375_v36  ;;  %v11903_v56 = vsub.f32 %v2852_v15, %v3375_v36  ;;  %v3885_v10 = vand.u32 4294901760, %v3876_v47  ;;  %v2854_v53 = vsub.f32 %v2846_v41, %v11763_v38  ;;  %v9882_v5 = vpop.f32.mrb[12].mxu0 }
 0x1c0   : > { %v11906_v23 = vsub.f32 %v3877_v16, %v3888_v54  ;;  %v4906_v13 = vand.u32 4294901760, %v2855_v60  ;;  %v5405_v11 = vadd.f32 %v2855_v60, %v11761_v45  ;;  %v2849_v28 = vsub.f32 %v9882_v5, %v11752_v55  ;;  %v2814_v44 = vpop.f32.mrb[13].mxu0 }
 0x1c1   : > { %v11910_v8 = vpack.c.bf16 %v3888_v54, %v3885_v10  ;;  %v11912_v21 = vsub.f32 %v3876_v47, %v3885_v10  ;;  %v4903_v57 = vand.u32 4294901760, %v2854_v53  ;;  %v5404_v15 = vadd.f32 %v2854_v53, %v11774_v40  ;;  %10487 = vmatprep.subr.bf16.mxu1 %v11901_v24 }
 0x1c2   : > { %v11916_v42 = vsub.f32 %v2855_v60, %v4906_v13  ;;  %v5410_v38 = vand.u32 4294901760, %v5405_v11  ;;  %v2857_v16 = vsub.f32 %v2849_v28, %v11779_v20  ;;  %v2848_v51 = vsub.f32 %v2814_v44, %v11765_v48  ;;  %10489 = vmatpush3.bf16.msra.mxu1 %v11901_v24 }
 0x1c3   : > { %v11921_v55 = vpack.c.bf16 %v4906_v13, %v4903_v57  ;;  %v4991_v45 = vsub.f32 %v2854_v53, %v4903_v57  ;;  %v5407_v59 = vand.u32 4294901760, %v5404_v15  ;;  %v9885_v36 = vpop.f32.mrb[14].mxu0  ;;  %v3464_v47 = vand.u32 4294901760, %v11903_v56 }
 0x1c4   : > { %v11924_v41 = vsub.f32 %v5405_v11, %v5410_v38  ;;  %v6428_v40 = vand.u32 4294901760, %v2857_v16  ;;  %v6927_v54 = vadd.f32 %v2857_v16, %v11790_v0  ;;  %v2856_v60 = vsub.f32 %v2848_v51, %v11792_v58  ;;  %v2826_v10 = vpop.f32.mrb[15].mxu0 }
 0x1c5   : > { %v11928_v20 = vpack.c.bf16 %v5410_v38, %v5407_v59  ;;  %v11930_v48 = vsub.f32 %v5404_v15, %v5407_v59  ;;  %v2851_v5 = vsub.f32 %v9885_v36, %v11782_v14  ;;  %v2850_v53 = vsub.f32 %v2826_v10, %v11795_v1  ;;  %9933 = vmatmul.mubr.f32.vlgmr.msra.gmra.mrb[10].mxu1 %v11899_v61 }
 0x1c6   : > { %v11935_v13 = vsub.f32 %v2857_v16, %v6428_v40  ;;  %v6932_v11 = vand.u32 4294901760, %v6927_v54  ;;  %v6425_v28 = vand.u32 4294901760, %v2856_v60  ;;  %v6926_v44 = vadd.f32 %v2856_v60, %v11805_v52  ;;  %10559 = vmatprep.subr.bf16.mxu0 %v11921_v55  ;;  %9939 = vmatprep.mubr.f32.mxu1 %v11705_v49 }
 0x1c7   : > { %v2859_v0 = vsub.f32 %v2851_v5, %v11812_v22  ;;  %v2858_v58 = vsub.f32 %v2850_v53, %v11822_v63  ;;  %10561 = vmatpush3.bf16.msra.mxu0 %v11921_v55  ;;  %v3465_v14 = vsub.f32 %v11903_v56, %v3464_v47  ;;  %v3471_v1 = vand.u32 4294901760, %v11896_v31 }
 0x1c8   : > { %v7024_v57 = vsub.f32 %v6927_v54, %v6932_v11  ;;  %v11945_v15 = vpack.c.bf16 %v6428_v40, %v6425_v28  ;;  %v11947_v38 = vsub.f32 %v2856_v60, %v6425_v28  ;;  %v6929_v52 = vand.u32 4294901760, %v6926_v44 }
 0x1c9   : > { %v7950_v16 = vand.u32 4294901760, %v2859_v0  ;;  %v8449_v51 = vadd.f32 %v2859_v0, %v11820_v29  ;;  %v7947_v59 = vand.u32 4294901760, %v2858_v58  ;;  %v8448_v22 = vadd.f32 %v2858_v58, %v11832_v50 }
 0x1ca   : > { %v11951_v36 = vpack.c.bf16 %v6932_v11, %v6929_v52  ;;  %v7017_v63 = vsub.f32 %v6926_v44, %v6929_v52  ;;  %v3466_v10 = vand.u32 4294901760, %v3465_v14  ;;  %v3472_v5 = vsub.f32 %v11896_v31, %v3471_v1  ;;  %10059 = vmatmul.mubr.f32.vlgmr.msra.gmra.mrb[16].mxu0 %v11899_v61 }
 0x1cb   : > { %v11955_v54 = vsub.f32 %v2859_v0, %v7950_v16  ;;  %v8454_v40 = vand.u32 4294901760, %v8449_v51  ;;  %v11957_v60 = vpack.c.bf16 %v7950_v16, %v7947_v59  ;;  %v8035_v53 = vsub.f32 %v2858_v58, %v7947_v59  ;;  %10065 = vmatprep.mubr.f32.mxu0 %v11705_v49 }
 0x1cc   : > { %v8451_v29 = vand.u32 4294901760, %v8448_v22  ;;  %v3473_v28 = vand.u32 4294901760, %v3472_v5  ;;  %v10494_v50 = vpack.c.bf16 %v11896_v31, %v11903_v56  ;;  %v4992_v11 = vand.u32 4294901760, %v4991_v45 }
 0x1cd   : > { %v11962_v44 = vsub.f32 %v8449_v51, %v8454_v40  ;;  %v4999_v14 = vand.u32 4294901760, %v11916_v42  ;;  %v10566_v52 = vpack.c.bf16 %v11916_v42, %v4991_v45  ;;  %v11966_v0 = vpack.c.bf16 %v3471_v1, %v3464_v47 }
 0x1ce   : > { %v11968_v25 = vpack.c.bf16 %v8454_v40, %v8451_v29  ;;  %v11970_v16 = vsub.f32 %v8448_v22, %v8451_v29  ;;  %v10490_v58 = vpack.c.bf16 %v3473_v28, %v3466_v10  ;;  %v4993_v59 = vsub.f32 %v4991_v45, %v4992_v11 }
 0x1cf   : > { %v5000_v5 = vsub.f32 %v11916_v42, %v4999_v14  ;;  %v11973_v3 = vpack.c.bf16 %v4999_v14, %v4992_v11  ;;  %v3974_v31 = vand.u32 4294901760, %v11912_v21  ;;  %v3981_v56 = vand.u32 4294901760, %v11906_v23 }
 0x1d0   : > { %12485 = vst [vmem:[#allocation11_spill] sm:$0xff] %v11968_v25  ;;  %10491 = vmatprep.subr.bf16.mxu1 %v10490_v58  ;;  %v4994_v51 = vand.u32 4294901760, %v4993_v59  ;;  %v11979_v47 = vpack.c.bf16 %v11906_v23, %v11912_v21  ;;  %v7018_v1 = vand.u32 4294901760, %v7017_v63  ;;  %v7025_v40 = vand.u32 4294901760, %v7024_v57 }
 0x1d1   : > { %10493 = vmatpush3.bf16.msra.mxu1 %v10490_v58  ;;  %v5001_v22 = vand.u32 4294901760, %v5000_v5  ;;  %v3975_v45 = vsub.f32 %v11912_v21, %v3974_v31  ;;  %v3982_v42 = vsub.f32 %v11906_v23, %v3981_v56  ;;  %v11983_v10 = vpack.c.bf16 %v3981_v56, %v3974_v31 }
 0x1d2   : > { %10495 = vmatprep.subr.bf16.mxu1 %v10494_v50  ;;  %v7019_v29 = vsub.f32 %v7017_v63, %v7018_v1  ;;  %v7026_v28 = vsub.f32 %v7024_v57, %v7025_v40  ;;  %v11985_v11 = vpack.c.bf16 %v7024_v57, %v7017_v63  ;;  %v11987_v14 = vpack.c.bf16 %v7025_v40, %v7018_v1 }
 0x1d3   : > { %v10562_v59 = vpack.c.bf16 %v5001_v22, %v4994_v51  ;;  %v3976_v25 = vand.u32 4294901760, %v3975_v45  ;;  %v3983_v35 = vand.u32 4294901760, %v3982_v42  ;;  %v5496_v43 = vand.u32 4294901760, %v11930_v48 }
 0x1d4   : > { %9940 = vmatmul.mubr.f32.vlgmr.msra.gmra.mrb[10].mxu1 %v11878_v6  ;;  %v7020_v58 = vand.u32 4294901760, %v7019_v29  ;;  %v7027_v21 = vand.u32 4294901760, %v7026_v28  ;;  %v5503_v23 = vand.u32 4294901760, %v11924_v41  ;;  %v11994_v5 = vpack.c.bf16 %v11924_v41, %v11930_v48 }
 0x1d5   : > { %10563 = vmatprep.subr.bf16.mxu0 %v10562_v59  ;;  %10497 = vmatpush3.bf16.msra.mxu1 %v10494_v50  ;;  %v11996_v57 = vpack.c.bf16 %v3983_v35, %v3976_v25  ;;  %v5497_v63 = vsub.f32 %v11930_v48, %v5496_v43  ;;  %v8036_v31 = vand.u32 4294901760, %v8035_v53  ;;  %v8043_v56 = vand.u32 4294901760, %v11955_v54 }
 0x1d6   : > { %10565 = vmatpush3.bf16.msra.mxu0 %v10562_v59  ;;  %10499 = vmatprep.subr.bf16.mxu1 %v11901_v24  ;;  %v12001_v51 = vpack.c.bf16 %v7027_v21, %v7020_v58  ;;  %v5504_v1 = vsub.f32 %v11924_v41, %v5503_v23  ;;  %v12005_v40 = vpack.c.bf16 %v11955_v54, %v8035_v53  ;;  %v6514_v22 = vand.u32 4294901760, %v11947_v38 }
 0x1d7   : > { %10567 = vmatprep.subr.bf16.mxu0 %v10566_v52  ;;  %9946 = vmatprep.mubr.f32.mxu1 %v11708_v62  ;;  %v5498_v25 = vand.u32 4294901760, %v5497_v63  ;;  %v8037_v35 = vsub.f32 %v8035_v53, %v8036_v31  ;;  %v8044_v48 = vsub.f32 %v11955_v54, %v8043_v56  ;;  %v12010_v50 = vpack.c.bf16 %v5503_v23, %v5496_v43 }
 0x1d8   : > { %v5505_v45 = vand.u32 4294901760, %v5504_v1  ;;  %v12012_v42 = vpack.c.bf16 %v8043_v56, %v8036_v31  ;;  %v6515_v29 = vsub.f32 %v11947_v38, %v6514_v22  ;;  %v6521_v41 = vand.u32 4294901760, %v11935_v13 }
 0x1d9   : > { %10066 = vmatmul.mubr.f32.vlgmr.msra.gmra.mrb[16].mxu0 %v11878_v6  ;;  %v8038_v28 = vand.u32 4294901760, %v8037_v35  ;;  %v8045_v59 = vand.u32 4294901760, %v8044_v48  ;;  %v12019_v58 = vpack.c.bf16 %v11935_v13, %v11947_v38  ;;  %v8540_v53 = vand.u32 4294901760, %v11970_v16 }
 0x1da   : > { %10569 = vmatpush3.bf16.msra.mxu0 %v10566_v52  ;;  %10072 = vmatprep.mubr.f32.mxu0 %v11708_v62  ;;  %v12023_v43 = vpack.c.bf16 %v5505_v45, %v5498_v25  ;;  %v6516_v54 = vand.u32 4294901760, %v6515_v29  ;;  %v6522_v21 = vsub.f32 %v11935_v13, %v6521_v41  ;;  %v12026_v23 = vpack.c.bf16 %v6521_v41, %v6514_v22 }
 0x1db   : > { %10571 = vmatprep.subr.bf16.mxu0 %v11921_v55  ;;  %v12029_v63 = vpack.c.bf16 %v8045_v59, %v8038_v28  ;;  %v8541_v31 = vsub.f32 %v11970_v16, %v8540_v53  ;;  %v8547_v38 = vand.u32 4294901760, %v11962_v44  ;;  %v12035_v52 = vpack.c.bf16 %v11962_v44, %v11970_v16 }
 0x1dc   : > { %9947 = vmatmul.mubr.f32.vlgmr.msra.gmra.mrb[10].mxu1 %v11881_v18  ;;  %v6523_v56 = vand.u32 4294901760, %v6522_v21  ;;  %v3879_v25 = vsel %vm473_vm0, %v11492_v32, 0  ;;  %v3882_v45 = vsel %vm473_vm0, %v11496_v4, 0 }
 0x1dd   : > { %10501 = vmatpush3.bf16.msra.mxu1 %v11901_v24  ;;  %9953 = vmatprep.mubr.f32.mxu1 %v11711_v39  ;;  %v8542_v13 = vand.u32 4294901760, %v8541_v31  ;;  %v8548_v1 = vsub.f32 %v11962_v44, %v8547_v38  ;;  %v12041_v22 = vpack.c.bf16 %v8547_v38, %v8540_v53  ;;  %v12049_v48 = vand.u32 4294901760, %v3879_v25  ;;  %v12487_v53 = vld [vmem:[#allocation2_spill] sm:$0xff] }
 0x1de   : > { %10503 = vmatprep.subr.bf16.mxu1 %v11966_v0  ;;  %v12046_v35 = vpack.c.bf16 %v6523_v56, %v6516_v54  ;;  %v12059_v32 = vand.u32 4294901760, %v3882_v45 }
 0x1df   : > { %v8549_v16 = vand.u32 4294901760, %v8548_v1  ;;  %v12064_v44 = vsub.f32 %v3879_v25, %v12049_v48 }
 0x1e0   : > { %v12068_v4 = vsub.f32 %v3882_v45, %v12059_v32 }
 0x1e1   : > { %10073 = vmatmul.mubr.f32.vlgmr.msra.gmra.mrb[16].mxu0 %v11881_v18  ;;  %v12053_v29 = vpack.c.bf16 %v8549_v16, %v8542_v13  ;;  %v12072_v41 = vand.u32 4294901760, %v12064_v44 }
 0x1e2   : > { %10573 = vmatpush3.bf16.msra.mxu0 %v11921_v55  ;;  %10079 = vmatprep.mubr.f32.mxu0 %v11711_v39 }
 0x1e3   : > { %10575 = vmatprep.subr.bf16.mxu0 %v11973_v3  ;;  %v3954_v28 = vsub.f32 %v12064_v44, %v12072_v41 }
 0x1e4   : > { %9954 = vmatmul.mubr.f32.vlgmr.msra.gmra.mrb[10].mxu1 %v11884_v17 }
 0x1e5   : > { %10505 = vmatpush3.bf16.msra.mxu1 %v11966_v0  ;;  %9960 = vmatprep.mubr.f32.mxu1 %v11705_v49  ;;  %v12079_v0 = vand.u32 4294901760, %v12068_v4  ;;  %v12089_v59 = vand.u32 4294901760, %v3954_v28 }
 0x1e6   : > { %10507 = vmatprep.subr.bf16.mxu1 %v11901_v24 }
 0x1e9   : > { %10080 = vmatmul.mubr.f32.vlgmr.msra.gmra.mrb[16].mxu0 %v11884_v17 }
 0x1ea   : > { %10577 = vmatpush3.bf16.msra.mxu0 %v11973_v3  ;;  %10086 = vmatprep.mubr.f32.mxu0 %v11705_v49  ;;  %v3964_v3 = vsub.f32 %v12068_v4, %v12079_v0 }
 0x1eb   : > { %10579 = vmatprep.subr.bf16.mxu0 %v11921_v55 }
 0x1ec   : > { %9961 = vmatmul.mubr.f32.vlgmr.msra.gmra.mrb[10].mxu1 %v11878_v6 }
 0x1ed   : > { %10509 = vmatpush3.bf16.msra.mxu1 %v11901_v24  ;;  %9967 = vmatprep.mubr.f32.mxu1 %v11705_v49  ;;  %v12095_v24 = vand.u32 4294901760, %v3964_v3 }
 0x1ee   : > { %10511 = vmatprep.subr.bf16.mxu1 %v11910_v8 }
 0x1f1   : > { %10087 = vmatmul.mubr.f32.vlgmr.msra.gmra.mrb[16].mxu0 %v11878_v6 }
 0x1f2   : > { %10581 = vmatpush3.bf16.msra.mxu0 %v11921_v55  ;;  %10093 = vmatprep.mubr.f32.mxu0 %v11705_v49  ;;  %v12486_v55 = vld [vmem:[#allocation8_spill] sm:$0xff] }
 0x1f3   : > { %10607 = vmatprep.subr.bf16.mxu0 %v11827_v12 }
 0x1f4   : > { %9968 = vmatmul.mubr.f32.vlgmr.msra.gmra.mrb[10].mxu1 %v11878_v6 }
 0x1f5   : > { %10513 = vmatpush3.bf16.msra.mxu1 %v11910_v8  ;;  %9974 = vmatprep.mubr.f32.mxu1 %v12089_v59 }
 0x1f6   : > { %10515 = vmatprep.subr.bf16.mxu1 %v11996_v57 }
 0x1f8   : > { %9975 = vmatmul.mubr.f32.vlgmr.msra.gmra.mrb[12].mxu1 %v12095_v24 }
 0x1f9   : > { %10517 = vmatpush3.bf16.msra.mxu1 %v11996_v57  ;;  %10094 = vmatmul.mubr.f32.vlgmr.msra.gmra.mrb[16].mxu0 %v11878_v6 }
 0x1fa   : > { %10609 = vmatpush3.bf16.msra.mxu0 %v11827_v12  ;;  %10519 = vmatprep.subr.bf16.mxu1 %v11979_v47 }
 0x1fb   : > { %10611 = vmatprep.subr.bf16.mxu0 %v11853_v19  ;;  %10142 = vmatprep.mubr.f32.mxu0 %v12486_v55 }
 0x1fc   : > { %9981 = vmatprep.mubr.f32.mxu1 %v12049_v48 }
 0x1fd   : > { %10143 = vmatmul.mubr.f32.vlgmr.msra.gmra.mrb[18].mxu0 %v12487_v53 }
 0x1fe   : > { %10613 = vmatpush3.bf16.msra.mxu0 %v11853_v19  ;;  %10149 = vmatprep.mubr.f32.mxu0 %v11680_v27 }
 0x1ff   : > { %10615 = vmatprep.subr.bf16.mxu0 %v11836_v7 }
 0x200   : > { %9982 = vmatmul.mubr.f32.vlgmr.msra.gmra.mrb[12].mxu1 %v12059_v32 }
 0x201   : > { %10521 = vmatpush3.bf16.msra.mxu1 %v11979_v47  ;;  %9988 = vmatprep.mubr.f32.mxu1 %v12064_v44 }
 0x202   : > { %10523 = vmatprep.subr.bf16.mxu1 %v11910_v8 }
 0x205   : > { %10150 = vmatmul.mubr.f32.vlgmr.msra.gmra.mrb[18].mxu0 %v11720_v37 }
 0x206   : > { %10617 = vmatpush3.bf16.msra.mxu0 %v11836_v7  ;;  %10156 = vmatprep.mubr.f32.mxu0 %v11684_v46  ;;  %v12488_v7 = vld [vmem:[#allocation4_spill] sm:$0xff] }
 0x207   : > { %10619 = vmatprep.subr.bf16.mxu0 %v11827_v12 }
 0x208   : > { %9989 = vmatmul.mubr.f32.vlgmr.msra.gmra.mrb[12].mxu1 %v12068_v4 }
 0x209   : > { %10525 = vmatpush3.bf16.msra.mxu1 %v11910_v8  ;;  %9995 = vmatprep.mubr.f32.mxu1 %v12072_v41 }
 0x20a   : > { %10527 = vmatprep.subr.bf16.mxu1 %v11983_v10 }
 0x20d   : > { %10157 = vmatmul.mubr.f32.vlgmr.msra.gmra.mrb[18].mxu0 %v11723_v26 }
 0x20e   : > { %10621 = vmatpush3.bf16.msra.mxu0 %v11827_v12  ;;  %10163 = vmatprep.mubr.f32.mxu0 %v11688_v33 }
 0x20f   : > { %10623 = vmatprep.subr.bf16.mxu0 %v11844_v30 }
 0x210   : > { %9996 = vmatmul.mubr.f32.vlgmr.msra.gmra.mrb[12].mxu1 %v12079_v0 }
 0x211   : > { %10529 = vmatpush3.bf16.msra.mxu1 %v11983_v10  ;;  %10002 = vmatprep.mubr.f32.mxu1 %v12049_v48 }
 0x212   : > { %10531 = vmatprep.subr.bf16.mxu1 %v11910_v8 }
 0x215   : > { %10164 = vmatmul.mubr.f32.vlgmr.msra.gmra.mrb[18].mxu0 %v11734_v9 }
 0x216   : > { %10625 = vmatpush3.bf16.msra.mxu0 %v11844_v30  ;;  %10170 = vmatprep.mubr.f32.mxu0 %v11680_v27 }
 0x217   : > { %10627 = vmatprep.subr.bf16.mxu0 %v11827_v12 }
 0x218   : > { %10003 = vmatmul.mubr.f32.vlgmr.msra.gmra.mrb[12].mxu1 %v12059_v32 }
 0x219   : > { %10533 = vmatpush3.bf16.msra.mxu1 %v11910_v8  ;;  %10009 = vmatprep.mubr.f32.mxu1 %v12049_v48 }
 0x21a   : > { %10535 = vmatprep.subr.bf16.mxu1 %v12488_v7 }
 0x21d   : > { %10171 = vmatmul.mubr.f32.vlgmr.msra.gmra.mrb[18].mxu0 %v11720_v37 }
 0x21e   : > { %10629 = vmatpush3.bf16.msra.mxu0 %v11827_v12  ;;  %10177 = vmatprep.mubr.f32.mxu0 %v11680_v27  ;;  %v12489_v12 = vld [vmem:[#allocation3_spill] sm:$0xff] }
 0x21f   : > { %10655 = vmatprep.subr.bf16.mxu0 %v11951_v36 }
 0x220   : > { %10010 = vmatmul.mubr.f32.vlgmr.msra.gmra.mrb[12].mxu1 %v12059_v32 }
 0x221   : > { %10537 = vmatpush3.bf16.msra.mxu1 %v12488_v7  ;;  %10016 = vmatprep.mubr.f32.mxu1 %v12486_v55 }
 0x222   : > { %10539 = vmatprep.subr.bf16.mxu1 %v11846_v34 }
 0x224   : > { %10017 = vmatmul.mubr.f32.vlgmr.msra.gmra.mrb[14].mxu1 %v12487_v53 }
 0x225   : > { %10541 = vmatpush3.bf16.msra.mxu1 %v11846_v34  ;;  %10178 = vmatmul.mubr.f32.vlgmr.msra.gmra.mrb[18].mxu0 %v11720_v37  ;;  %v12490_v34 = vld [vmem:[#allocation5_spill] sm:$0xff] }
 0x226   : > { %10657 = vmatpush3.bf16.msra.mxu0 %v11951_v36  ;;  %10543 = vmatprep.subr.bf16.mxu1 %v12489_v12 }
 0x227   : > { %10659 = vmatprep.subr.bf16.mxu0 %v12001_v51  ;;  %10226 = vmatprep.mubr.f32.mxu0 %v12089_v59 }
 0x228   : > { %10023 = vmatprep.mubr.f32.mxu1 %v11680_v27 }
 0x229   : > { %10227 = vmatmul.mubr.f32.vlgmr.msra.gmra.mrb[20].mxu0 %v12095_v24 }
 0x22a   : > { %10661 = vmatpush3.bf16.msra.mxu0 %v12001_v51  ;;  %10233 = vmatprep.mubr.f32.mxu0 %v12049_v48 }
 0x22b   : > { %10663 = vmatprep.subr.bf16.mxu0 %v11985_v11 }
 0x22c   : > { %10024 = vmatmul.mubr.f32.vlgmr.msra.gmra.mrb[14].mxu1 %v11720_v37 }
 0x22d   : > { %10545 = vmatpush3.bf16.msra.mxu1 %v12489_v12  ;;  %10030 = vmatprep.mubr.f32.mxu1 %v11684_v46 }
 0x22e   : > { %10547 = vmatprep.subr.bf16.mxu1 %v12488_v7 }
 0x231   : > { %10234 = vmatmul.mubr.f32.vlgmr.msra.gmra.mrb[20].mxu0 %v12059_v32 }
 0x232   : > { %10665 = vmatpush3.bf16.msra.mxu0 %v11985_v11  ;;  %10240 = vmatprep.mubr.f32.mxu0 %v12064_v44 }
 0x233   : > { %10667 = vmatprep.subr.bf16.mxu0 %v11951_v36 }
 0x234   : > { %10031 = vmatmul.mubr.f32.vlgmr.msra.gmra.mrb[14].mxu1 %v11723_v26 }
 0x235   : > { %10549 = vmatpush3.bf16.msra.mxu1 %v12488_v7  ;;  %10037 = vmatprep.mubr.f32.mxu1 %v11688_v33 }
 0x236   : > { %10551 = vmatprep.subr.bf16.mxu1 %v12490_v34 }
 0x239   : > { %10241 = vmatmul.mubr.f32.vlgmr.msra.gmra.mrb[20].mxu0 %v12068_v4 }
 0x23a   : > { %10669 = vmatpush3.bf16.msra.mxu0 %v11951_v36  ;;  %10247 = vmatprep.mubr.f32.mxu0 %v12072_v41 }
 0x23b   : > { %10671 = vmatprep.subr.bf16.mxu0 %v11987_v14 }
 0x23c   : > { %10038 = vmatmul.mubr.f32.vlgmr.msra.gmra.mrb[14].mxu1 %v11734_v9 }
 0x23d   : > { %10553 = vmatpush3.bf16.msra.mxu1 %v12490_v34  ;;  %10044 = vmatprep.mubr.f32.mxu1 %v11680_v27 }
 0x23e   : > { %10555 = vmatprep.subr.bf16.mxu1 %v12488_v7 }
 0x241   : > { %10248 = vmatmul.mubr.f32.vlgmr.msra.gmra.mrb[20].mxu0 %v12079_v0 }
 0x242   : > { %10673 = vmatpush3.bf16.msra.mxu0 %v11987_v14  ;;  %10254 = vmatprep.mubr.f32.mxu0 %v12049_v48 }
 0x243   : > { %10675 = vmatprep.subr.bf16.mxu0 %v11951_v36 }
 0x244   : > { %10045 = vmatmul.mubr.f32.vlgmr.msra.gmra.mrb[14].mxu1 %v11720_v37 }
 0x245   : > { %10557 = vmatpush3.bf16.msra.mxu1 %v12488_v7  ;;  %10051 = vmatprep.mubr.f32.mxu1 %v11680_v27 }
 0x246   : > { %10583 = vmatprep.subr.bf16.mxu1 %v11928_v20 }
 0x249   : > { %10255 = vmatmul.mubr.f32.vlgmr.msra.gmra.mrb[20].mxu0 %v12059_v32 }
 0x24a   : > { %10677 = vmatpush3.bf16.msra.mxu0 %v11951_v36  ;;  %10261 = vmatprep.mubr.f32.mxu0 %v12049_v48 }
 0x24b   : > { %10703 = vmatprep.subr.bf16.mxu0 %v11957_v60 }
 0x24c   : > { %10052 = vmatmul.mubr.f32.vlgmr.msra.gmra.mrb[14].mxu1 %v11720_v37 }
 0x24d   : > { %10585 = vmatpush3.bf16.msra.mxu1 %v11928_v20  ;;  %10100 = vmatprep.mubr.f32.mxu1 %v12089_v59 }
 0x24e   : > { %10587 = vmatprep.subr.bf16.mxu1 %v12023_v43 }
 0x250   : > { %10101 = vmatmul.mubr.f32.vlgmr.msra.gmra.mrb[16].mxu1 %v12095_v24 }
 0x251   : > { %10589 = vmatpush3.bf16.msra.mxu1 %v12023_v43  ;;  %10262 = vmatmul.mubr.f32.vlgmr.msra.gmra.mrb[20].mxu0 %v12059_v32 }
 0x252   : > { %10705 = vmatpush3.bf16.msra.mxu0 %v11957_v60  ;;  %10591 = vmatprep.subr.bf16.mxu1 %v11994_v5 }
 0x253   : > { %10707 = vmatprep.subr.bf16.mxu0 %v12029_v63  ;;  %10310 = vmatprep.mubr.f32.mxu0 %v11715_v2 }
 0x254   : > { %10107 = vmatprep.mubr.f32.mxu1 %v12049_v48 }
 0x255   : > { %10311 = vmatmul.mubr.f32.vlgmr.msra.gmra.mrb[22].mxu0 %v11899_v61 }
 0x256   : > { %10709 = vmatpush3.bf16.msra.mxu0 %v12029_v63  ;;  %10317 = vmatprep.mubr.f32.mxu0 %v11705_v49 }
 0x257   : > { %10711 = vmatprep.subr.bf16.mxu0 %v12005_v40 }
 0x258   : > { %10108 = vmatmul.mubr.f32.vlgmr.msra.gmra.mrb[16].mxu1 %v12059_v32 }
 0x259   : > { %10593 = vmatpush3.bf16.msra.mxu1 %v11994_v5  ;;  %10114 = vmatprep.mubr.f32.mxu1 %v12064_v44 }
 0x25a   : > { %10595 = vmatprep.subr.bf16.mxu1 %v11928_v20 }
 0x25d   : > { %10318 = vmatmul.mubr.f32.vlgmr.msra.gmra.mrb[22].mxu0 %v11878_v6 }
 0x25e   : > { %10713 = vmatpush3.bf16.msra.mxu0 %v12005_v40  ;;  %10324 = vmatprep.mubr.f32.mxu0 %v11708_v62 }
 0x25f   : > { %10715 = vmatprep.subr.bf16.mxu0 %v11957_v60 }
 0x260   : > { %10115 = vmatmul.mubr.f32.vlgmr.msra.gmra.mrb[16].mxu1 %v12068_v4 }
 0x261   : > { %10597 = vmatpush3.bf16.msra.mxu1 %v11928_v20  ;;  %10121 = vmatprep.mubr.f32.mxu1 %v12072_v41 }
 0x262   : > { %10599 = vmatprep.subr.bf16.mxu1 %v12010_v50  ;;  %v12220_v30 = vpop.f32.mrb[8].mxu1 }
 0x263   : > { %v12222_v19 = vpop.f32.mrb[9].mxu1 }
 0x265   : > { %10325 = vmatmul.mubr.f32.vlgmr.msra.gmra.mrb[22].mxu0 %v11881_v18 }
 0x266   : > { %10717 = vmatpush3.bf16.msra.mxu0 %v11957_v60  ;;  %10331 = vmatprep.mubr.f32.mxu0 %v11711_v39 }
 0x267   : > { %10719 = vmatprep.subr.bf16.mxu0 %v12012_v42 }
 0x268   : > { %10122 = vmatmul.mubr.f32.vlgmr.msra.gmra.mrb[16].mxu1 %v12079_v0 }
 0x269   : > { %10601 = vmatpush3.bf16.msra.mxu1 %v12010_v50  ;;  %10128 = vmatprep.mubr.f32.mxu1 %v12049_v48 }
 0x26a   : > { %10603 = vmatprep.subr.bf16.mxu1 %v11928_v20 }
 0x26d   : > { %10332 = vmatmul.mubr.f32.vlgmr.msra.gmra.mrb[22].mxu0 %v11884_v17 }
 0x26e   : > { %10721 = vmatpush3.bf16.msra.mxu0 %v12012_v42  ;;  %10338 = vmatprep.mubr.f32.mxu0 %v11705_v49 }
 0x26f   : > { %10723 = vmatprep.subr.bf16.mxu0 %v11957_v60 }
 0x270   : > { %10129 = vmatmul.mubr.f32.vlgmr.msra.gmra.mrb[16].mxu1 %v12059_v32 }
 0x271   : > { %10605 = vmatpush3.bf16.msra.mxu1 %v11928_v20  ;;  %10135 = vmatprep.mubr.f32.mxu1 %v12049_v48 }
 0x272   : > { %10631 = vmatprep.subr.bf16.mxu1 %v11945_v15 }
 0x275   : > { %10339 = vmatmul.mubr.f32.vlgmr.msra.gmra.mrb[22].mxu0 %v11878_v6 }
 0x276   : > { %10725 = vmatpush3.bf16.msra.mxu0 %v11957_v60  ;;  %10345 = vmatprep.mubr.f32.mxu0 %v11705_v49 }
 0x278   : > { %10136 = vmatmul.mubr.f32.vlgmr.msra.gmra.mrb[16].mxu1 %v12059_v32 }
 0x279   : > { %10633 = vmatpush3.bf16.msra.mxu1 %v11945_v15  ;;  %10184 = vmatprep.mubr.f32.mxu1 %v11715_v2  ;;  %v12493_v2 = vld [vmem:[#allocation7_spill] sm:$0xff] }
 0x27a   : > { %10635 = vmatprep.subr.bf16.mxu1 %v12046_v35 }
 0x27c   : > { %10185 = vmatmul.mubr.f32.vlgmr.msra.gmra.mrb[18].mxu1 %v11899_v61  ;;  %v12495_v61 = vld [vmem:[#allocation11_spill] sm:$0xff] }
 0x27d   : > { %10637 = vmatpush3.bf16.msra.mxu1 %v12046_v35  ;;  %10191 = vmatprep.mubr.f32.mxu1 %v11705_v49 }
 0x27e   : > { %10639 = vmatprep.subr.bf16.mxu1 %v12019_v58  ;;  %10346 = vmatmul.mubr.f32.vlgmr.msra.gmra.mrb[22].mxu0 %v11878_v6 }
 0x284   : > { %10192 = vmatmul.mubr.f32.vlgmr.msra.gmra.mrb[18].mxu1 %v11878_v6 }
 0x285   : > { %10641 = vmatpush3.bf16.msra.mxu1 %v12019_v58  ;;  %10198 = vmatprep.mubr.f32.mxu1 %v11708_v62  ;;  %v12491_v62 = vld [vmem:[#allocation6_spill] sm:$0xff] }
 0x286   : > { %10643 = vmatprep.subr.bf16.mxu1 %v11945_v15 }
 0x28c   : > { %10199 = vmatmul.mubr.f32.vlgmr.msra.gmra.mrb[18].mxu1 %v11881_v18 }
 0x28d   : > { %10645 = vmatpush3.bf16.msra.mxu1 %v11945_v15  ;;  %10205 = vmatprep.mubr.f32.mxu1 %v11711_v39  ;;  %v12492_v39 = vld [vmem:[#allocation10_spill] sm:$0xff] }
 0x28e   : > { %10647 = vmatprep.subr.bf16.mxu1 %v12026_v23 }
 0x294   : > { %10206 = vmatmul.mubr.f32.vlgmr.msra.gmra.mrb[18].mxu1 %v11884_v17 }
 0x295   : > { %10649 = vmatpush3.bf16.msra.mxu1 %v12026_v23  ;;  %10212 = vmatprep.mubr.f32.mxu1 %v11705_v49 }
 0x296   : > { %10651 = vmatprep.subr.bf16.mxu1 %v11945_v15 }
 0x29c   : > { %10213 = vmatmul.mubr.f32.vlgmr.msra.gmra.mrb[18].mxu1 %v11878_v6 }
 0x29d   : > { %10653 = vmatpush3.bf16.msra.mxu1 %v11945_v15  ;;  %10219 = vmatprep.mubr.f32.mxu1 %v11705_v49  ;;  %v12494_v49 = vld [vmem:[#allocation9_spill] sm:$0xff] }
 0x29e   : > { %10679 = vmatprep.subr.bf16.mxu1 %v12491_v62 }
 0x2a4   : > { %10220 = vmatmul.mubr.f32.vlgmr.msra.gmra.mrb[18].mxu1 %v11878_v6 }
 0x2a5   : > { %10681 = vmatpush3.bf16.msra.mxu1 %v12491_v62  ;;  %10268 = vmatprep.mubr.f32.mxu1 %v12486_v55 }
 0x2a6   : > { %10683 = vmatprep.subr.bf16.mxu1 %v12492_v39 }
 0x2a8   : > { %10269 = vmatmul.mubr.f32.vlgmr.msra.gmra.mrb[20].mxu1 %v12487_v53 }
 0x2a9   : > { %10685 = vmatpush3.bf16.msra.mxu1 %v12492_v39  ;;  %10275 = vmatprep.mubr.f32.mxu1 %v11680_v27 }
 0x2aa   : > { %10687 = vmatprep.subr.bf16.mxu1 %v12493_v2 }
 0x2b0   : > { %10276 = vmatmul.mubr.f32.vlgmr.msra.gmra.mrb[20].mxu1 %v11720_v37 }
 0x2b1   : > { %10689 = vmatpush3.bf16.msra.mxu1 %v12493_v2  ;;  %10282 = vmatprep.mubr.f32.mxu1 %v11684_v46  ;;  %v12292_v46 = vld [vmem:[%s388_s12 + $0x8] sm:$0xff] }
 0x2b2   : > { %10691 = vmatprep.subr.bf16.mxu1 %v12491_v62 }
 0x2b8   : > { %10283 = vmatmul.mubr.f32.vlgmr.msra.gmra.mrb[20].mxu1 %v11723_v26 }
 0x2b9   : > { %10693 = vmatpush3.bf16.msra.mxu1 %v12491_v62  ;;  %10289 = vmatprep.mubr.f32.mxu1 %v11688_v33  ;;  %v12295_v33 = vld [vmem:[%s388_s12] sm:$0xff] }
 0x2ba   : > { %10695 = vmatprep.subr.bf16.mxu1 %v12494_v49 }
 0x2c0   : > { %10290 = vmatmul.mubr.f32.vlgmr.msra.gmra.mrb[20].mxu1 %v11734_v9 }
 0x2c1   : > { %10697 = vmatpush3.bf16.msra.mxu1 %v12494_v49  ;;  %10296 = vmatprep.mubr.f32.mxu1 %v11680_v27 }
 0x2c2   : > { %10699 = vmatprep.subr.bf16.mxu1 %v12491_v62 }
 0x2c7   : > { %v9969_v26 = vpop.f32.mrb[10].mxu1 }
 0x2c8   : > { %v4387_v6 = vsub.f32 %v12220_v30, %v9969_v26  ;;  %v3866_v18 = vpop.f32.mrb[11].mxu1  ;;  %10297 = vmatmul.mubr.f32.vlgmr.msra.gmra.mrb[20].mxu1 %v11720_v37 }
 0x2c9   : > { %v4386_v9 = vsub.f32 %v12222_v19, %v3866_v18  ;;  %10701 = vmatpush3.bf16.msra.mxu1 %v12491_v62  ;;  %10303 = vmatprep.mubr.f32.mxu1 %v11680_v27 }
 0x2ca   : > { %v4393_v17 = vmul.f32 %v4387_v6, %v12292_v46  ;;  %10727 = vmatprep.subr.bf16.mxu1 %v12495_v61 }
 0x2cb   : > { %v4392_v8 = vmul.f32 %v4386_v9, %v12295_v33 }
 0x2cc   : > { %4395 = vst.msk [vmem:[%s12302_s17 + $0x8] sm:$0xff] %vm473_vm0, %v4393_v17  ;;  %v10095_v20 = vpop.f32.mrb[16].mxu0 }
 0x2cd   : > { %4394 = vst.msk [vmem:[%s12302_s17] sm:$0xff] %vm473_vm0, %v4392_v8  ;;  %v5394_v15 = vpop.f32.mrb[17].mxu0 }
 0x2d0   : > { %10304 = vmatmul.mubr.f32.vlgmr.msra.gmra.mrb[20].mxu1 %v11720_v37 }
 0x2d1   : > { %10729 = vmatpush3.bf16.msra.mxu1 %v12495_v61  ;;  %10352 = vmatprep.mubr.f32.mxu1 %v12089_v59 }
 0x2d2   : > { %10731 = vmatprep.subr.bf16.mxu1 %v12053_v29 }
 0x2d4   : > { %10353 = vmatmul.mubr.f32.vlgmr.msra.gmra.mrb[22].mxu1 %v12095_v24 }
 0x2d5   : > { %10733 = vmatpush3.bf16.msra.mxu1 %v12053_v29  ;;  %10359 = vmatprep.mubr.f32.mxu1 %v12049_v48 }
 0x2d6   : > { %10735 = vmatprep.subr.bf16.mxu1 %v12035_v52 }
 0x2dc   : > { %10360 = vmatmul.mubr.f32.vlgmr.msra.gmra.mrb[22].mxu1 %v12059_v32 }
 0x2dd   : > { %10737 = vmatpush3.bf16.msra.mxu1 %v12035_v52  ;;  %10366 = vmatprep.mubr.f32.mxu1 %v12064_v44 }
 0x2de   : > { %10739 = vmatprep.subr.bf16.mxu1 %v12495_v61 }
 0x2e4   : > { %10367 = vmatmul.mubr.f32.vlgmr.msra.gmra.mrb[22].mxu1 %v12068_v4 }
 0x2e5   : > { %10741 = vmatpush3.bf16.msra.mxu1 %v12495_v61  ;;  %10373 = vmatprep.mubr.f32.mxu1 %v12072_v41 }
 0x2e6   : > { %10743 = vmatprep.subr.bf16.mxu1 %v12041_v22 }
 0x2ec   : > { %10374 = vmatmul.mubr.f32.vlgmr.msra.gmra.mrb[22].mxu1 %v12079_v0 }
 0x2ed   : > { %10745 = vmatpush3.bf16.msra.mxu1 %v12041_v22  ;;  %10380 = vmatprep.mubr.f32.mxu1 %v12049_v48 }
 0x2ee   : > { %10747 = vmatprep.subr.bf16.mxu1 %v12495_v61 }
 0x2f3   : > { %v10011_v27 = vpop.f32.mrb[12].mxu1 }
 0x2f4   : > { %v4389_v37 = vsub.f32 %v10011_v27, %v12220_v30  ;;  %v4376_v36 = vpop.f32.mrb[13].mxu1  ;;  %10381 = vmatmul.mubr.f32.vlgmr.msra.gmra.mrb[22].mxu1 %v12059_v32 }
 0x2f5   : > { %v4388_v60 = vsub.f32 %v4376_v36, %v12222_v19  ;;  %10749 = vmatpush3.bf16.msra.mxu1 %v12495_v61  ;;  %10387 = vmatprep.mubr.f32.mxu1 %v12049_v48 }
 0x2f6   : > { %v4391_v47 = vsub.f32 %v4389_v37, %v9969_v26 }
 0x2f7   : > { %v4390_v10 = vsub.f32 %v4388_v60, %v3866_v18 }
 0x2f8   : > { %v4397_v11 = vmul.f32 %v4391_v47, %v12292_v46  ;;  %v10179_v14 = vpop.f32.mrb[18].mxu0 }
 0x2f9   : > { %v4396_v5 = vmul.f32 %v4390_v10, %v12295_v33  ;;  %v6414_v57 = vpop.f32.mrb[19].mxu0 }
 0x2fa   : > { %4399 = vst.msk [vmem:[%s12343_s19 + $0x8] sm:$0xff] %vm473_vm0, %v4397_v11 }
 0x2fb   : > { %4398 = vst.msk [vmem:[%s12343_s19] sm:$0xff] %vm473_vm0, %v4396_v5 }
 0x2fc   : > { %10388 = vmatmul.mubr.f32.vlgmr.msra.gmra.mrb[22].mxu1 %v12059_v32 }
 0x31f   : > { %v10053_v51 = vpop.f32.mrb[14].mxu1 }
 0x320   : > { %v5909_v40 = vsub.f32 %v10053_v51, %v10095_v20  ;;  %v4892_v50 = vpop.f32.mrb[15].mxu1 }
 0x321   : > { %v5908_v42 = vsub.f32 %v4892_v50, %v5394_v15 }
 0x322   : > { %v5915_v58 = vmul.f32 %v5909_v40, %v12292_v46 }
 0x323   : > { %v5914_v43 = vmul.f32 %v5908_v42, %v12295_v33 }
 0x324   : > { %5917 = vst.msk [vmem:[%s12302_s17 + $0x18] sm:$0xff] %vm473_vm0, %v5915_v58  ;;  %v10263_v54 = vpop.f32.mrb[20].mxu0 }
 0x325   : > { %5916 = vst.msk [vmem:[%s12302_s17 + $0x10] sm:$0xff] %vm473_vm0, %v5914_v43  ;;  %v7433_v21 = vsub.f32 %v10263_v54, %v10179_v14  ;;  %v7420_v23 = vpop.f32.mrb[21].mxu0 }
 0x326   : > { %v7432_v63 = vsub.f32 %v7420_v23, %v6414_v57 }
 0x34b   : > { %v10137_v31 = vpop.f32.mrb[16].mxu1 }
 0x34c   : > { %v5911_v38 = vsub.f32 %v10137_v31, %v10053_v51  ;;  %v5898_v52 = vpop.f32.mrb[17].mxu1 }
 0x34d   : > { %v5910_v56 = vsub.f32 %v5898_v52, %v4892_v50 }
 0x34e   : > { %v5913_v13 = vsub.f32 %v5911_v38, %v10095_v20 }
 0x34f   : > { %v5912_v1 = vsub.f32 %v5910_v56, %v5394_v15 }
 0x350   : > { %v5919_v22 = vmul.f32 %v5913_v13, %v12292_v46 }
 0x351   : > { %v5918_v25 = vmul.f32 %v5912_v1, %v12295_v33  ;;  %v10347_v35 = vpop.f32.mrb[22].mxu0 }
 0x352   : > { %5921 = vst.msk [vmem:[%s12343_s19 + $0x18] sm:$0xff] %vm473_vm0, %v5919_v22  ;;  %v8438_v16 = vpop.f32.mrb[23].mxu0 }
 0x353   : > { %5920 = vst.msk [vmem:[%s12343_s19 + $0x10] sm:$0xff] %vm473_vm0, %v5918_v25 }
 0x377   : > { %v10221_v48 = vpop.f32.mrb[18].mxu1 }
 0x378   : > { %v7431_v45 = vsub.f32 %v10179_v14, %v10221_v48  ;;  %v7435_v29 = vsub.f32 %v7433_v21, %v10221_v48  ;;  %v6916_v32 = vpop.f32.mrb[19].mxu1 }
 0x379   : > { %v7430_v44 = vsub.f32 %v6414_v57, %v6916_v32  ;;  %v7434_v4 = vsub.f32 %v7432_v63, %v6916_v32 }
 0x37a   : > { %v7437_v41 = vmul.f32 %v7431_v45, %v12292_v46  ;;  %v7441_v0 = vmul.f32 %v7435_v29, %v12292_v46 }
 0x37b   : > { %v7436_v28 = vmul.f32 %v7430_v44, %v12295_v33  ;;  %v7440_v3 = vmul.f32 %v7434_v4, %v12295_v33 }
 0x37c   : > { %7439 = vst.msk [vmem:[%s12302_s17 + $0x28] sm:$0xff] %vm473_vm0, %v7437_v41  ;;  %7443 = vst.msk [vmem:[%s12343_s19 + $0x28] sm:$0xff] %vm473_vm0, %v7441_v0 }
 0x37d   : > { %7438 = vst.msk [vmem:[%s12302_s17 + $0x20] sm:$0xff] %vm473_vm0, %v7436_v28  ;;  %7442 = vst.msk [vmem:[%s12343_s19 + $0x20] sm:$0xff] %vm473_vm0, %v7440_v3 }
 0x3a3   : > { %v10305_v59 = vpop.f32.mrb[20].mxu1 }
 0x3a4   : > { %v8953_v24 = vsub.f32 %v10305_v59, %v10347_v35  ;;  %v7936_v55 = vpop.f32.mrb[21].mxu1 }
 0x3a5   : > { %v8952_v53 = vsub.f32 %v7936_v55, %v8438_v16 }
 0x3a6   : > { %v8959_v7 = vmul.f32 %v8953_v24, %v12292_v46 }
 0x3a7   : > { %v8958_v12 = vmul.f32 %v8952_v53, %v12295_v33 }
 0x3a8   : > { %8961 = vst.msk [vmem:[%s12302_s17 + $0x38] sm:$0xff] %vm473_vm0, %v8959_v7 }
 0x3a9   : > { %8960 = vst.msk [vmem:[%s12302_s17 + $0x30] sm:$0xff] %vm473_vm0, %v8958_v12 }
 0x3cf   : > { %v10389_v34 = vpop.f32.mrb[22].mxu1 }
 0x3d0   : > { %v8955_v30 = vsub.f32 %v10389_v34, %v10305_v59  ;;  %v8942_v19 = vpop.f32.mrb[23].mxu1 }
 0x3d1   : > { %v8954_v62 = vsub.f32 %v8942_v19, %v7936_v55 }
 0x3d2   : > { %v8957_v39 = vsub.f32 %v8955_v30, %v10347_v35 }
 0x3d3   : > { %v8956_v2 = vsub.f32 %v8954_v62, %v8438_v16 }
 0x3d4   : > { %v8963_v49 = vmul.f32 %v8957_v39, %v12292_v46 }
 0x3d5   : > { %v8962_v26 = vmul.f32 %v8956_v2, %v12295_v33 }
 0x3d6   : > { %8965 = vst.msk [vmem:[%s12343_s19 + $0x38] sm:$0xff] %vm473_vm0, %v8963_v49 }
 0x3d7   : > { %8964 = vst.msk [vmem:[%s12343_s19 + $0x30] sm:$0xff] %vm473_vm0, %v8962_v26 }
 0x3d8 PF: > { %s19_s27 = sadd.s32 1, %s11005_s27  }
 0x3d9   : > { %p16_p4 = scmp.ge.s32.totalorder %s19_s27, 4  }
 0x3db   :  { %18 = sbr.rel (!%p16_p4) target bundleno = 1 (0x1), region = 102 }

</bundles_post_ra>
